<compile_context>
chip_gen: v6e
topology: v6e:2x2x1
jax: 0.10.0
libtpu: 0.0.40
codegen_flags: <defaults>
</compile_context>

<pallas_src>
from functools import partial

import jax
import jax.numpy as jnp
from jax import lax
from jax.experimental import pallas as pl
from jax.experimental.pallas import tpu as pltpu


_TB_CAP = 128  # batch-tile cap; raise to 256 on v6e/v7x if desired.


# ---------------------------------------------------------------------------
# Fused forward kernel (TB samples per grid step)
# ---------------------------------------------------------------------------
def _fused_kernel(x_ref, a1_ref, b1_ref, a2_ref, b2_ref,
                  wfc_ref, bfc_ref, wh_ref, bh_ref, out_ref,
                  h1_ref, h2_ref, *, tb, oh1, oh2):
    f32 = jnp.float32
    k1 = x_ref.shape[-1]                      # padded W*C (128)

    # conv1: three row-shifted taps, each an (oh1*tb, k1) x (k1, n1) GEMM.
    # x rows are ordered (h, sample); tile-clean since tb % 8 == 0.
    def tap1(kh):
        xs = x_ref[kh:kh + oh1, :, :].reshape(oh1 * tb, k1)
        return jnp.dot(xs, a1_ref[kh], preferred_element_type=f32)

    acc1 = tap1(0) + tap1(1) + tap1(2)
    h1_ref[...] = jnp.maximum(acc1 + b1_ref[...], 0.0)       # (oh1*tb, n1)

    # conv2: same structure; taps are contiguous row ranges of h1 (h-major).
    def tap2(kh):
        return jnp.dot(h1_ref[kh * tb:(kh + oh2) * tb, :], a2_ref[kh],
                       preferred_element_type=f32)

    acc2 = tap2(0) + tap2(1) + tap2(2)
    h2_ref[...] = jnp.maximum(acc2 + b2_ref[...], 0.0)       # (oh2*tb, n2p)

    # FC trunk: NCHW-flatten order folded into wfc_ref; oh2 GEMMs with M = tb.
    accf = jnp.dot(h2_ref[0:tb, :], wfc_ref[0], preferred_element_type=f32)
    for hh in range(1, oh2):
        accf = accf + jnp.dot(h2_ref[hh * tb:(hh + 1) * tb, :], wfc_ref[hh],
                              preferred_element_type=f32)
    hid = jnp.maximum(accf + bfc_ref[...], 0.0)               # (tb, 128)

    # Fused heads (action logits | state value) — one lane-dense GEMM.
    out_ref[...] = (jnp.dot(hid, wh_ref[...], preferred_element_type=f32)
                    + bh_ref[...]).astype(out_ref.dtype)


# ---------------------------------------------------------------------------
# One-time weight re-layout (runs once, outside the hot path)
# ---------------------------------------------------------------------------
def _conv_to_rowshift(w_oihw, w_in):
    """Per-kh row-shift GEMM weights for a valid 3x3 conv in (H, W*C) layout.

    Returns (KH, w_in*Cin, OW*Cout) such that for row windows X_kh = x[kh:kh+OH]
    (cols ordered (w, c)), sum_kh X_kh @ A[kh] is the conv output, cols (ow, n).
    """
    cout, cin, kh_sz, kw_sz = w_oihw.shape
    ow = w_in - kw_sz + 1
    w_t = jnp.transpose(w_oihw, (2, 3, 1, 0)).astype(jnp.float32)  # (kh,kw,c,n)
    shift = jnp.stack([jnp.eye(w_in, ow, k=-kw, dtype=jnp.float32)
                       for kw in range(kw_sz)])                    # (kw, w_in, ow)
    a = jnp.einsum("kwo,hkcn->hwcon", shift, w_t)                  # (kh,w,c,ow,n)
    return a.reshape(kh_sz, w_in * cin, ow * cout)


def prepare_params(params, board_size, n_actions):
    f32 = jnp.float32
    p = {k: v.astype(f32) for k, v in params.items()}
    n_frames = p["w1"].shape[1]
    c2 = p["w2"].shape[0]                       # 32
    hid = p["wfc"].shape[0]                     # 64
    oh1, oh2 = board_size - 2, board_size - 4
    assert p["wfc"].shape[1] == c2 * oh2 * oh2
    assert n_actions + 1 <= 128 and hid <= 128

    wc = board_size * n_frames
    k1 = 128 * pl.cdiv(wc, 128)                 # lane-padded x width
    n2 = oh2 * c2                               # conv2 out cols (ow2, c2)
    n2p = 128 * pl.cdiv(n2, 128)                # lane-padded conv2 width

    a1 = _conv_to_rowshift(p["w1"], board_size)            # (3, wc,  oh1*16)
    a1 = jnp.pad(a1, ((0, 0), (0, k1 - wc), (0, 0)))        # pad K to 128
    a2 = _conv_to_rowshift(p["w2"], oh1)                    # (3, oh1*16, n2)
    a2 = jnp.pad(a2, ((0, 0), (0, 0), (0, n2p - n2)))        # pad N to 256
    b1t = jnp.tile(p["b1"], oh1)[None, :]                    # (1, oh1*16)
    b2t = jnp.pad(jnp.tile(p["b2"], oh2), (0, n2p - n2))[None, :]   # (1, n2p)

    # Fold PyTorch NCHW flatten (c*oh2*ow2 + h*ow2 + w) into wfc row ordering
    # (h, w*c2 + c); pad K (192 -> 256) and hidden (64 -> 128) with zeros.
    wfc_r = p["wfc"].reshape(hid, c2, oh2, oh2)              # (n, c, h, w)
    wfc3 = jnp.transpose(wfc_r, (2, 3, 1, 0)).reshape(oh2, n2, hid)
    wfc3 = jnp.pad(wfc3, ((0, 0), (0, n2p - n2), (0, 128 - hid)))
    bfc_p = jnp.pad(p["bfc"], (0, 128 - hid))[None, :]        # (1, 128)

    # Fused zero-padded heads: cols [0:A) = action logits, col A = state value.
    wh = jnp.zeros((128, 128), f32)
    wh = wh.at[:hid, :n_actions].set(p["wa"].T)
    wh = wh.at[:hid, n_actions:n_actions + 1].set(p["wv"].T)
    bh = jnp.zeros((1, 128), f32)
    bh = bh.at[0, :n_actions].set(p["ba"])
    bh = bh.at[0, n_actions:n_actions + 1].set(p["bv"])

    return dict(a1=a1, b1t=b1t, a2=a2, b2t=b2t,
                wfc3=wfc3, bfc_p=bfc_p, wh=wh, bh=bh)


def init_params(key, n_frames, n_actions):
    # PyTorch-style uniform(-1/sqrt(fan_in), 1/sqrt(fan_in)) init.
    ks = jax.random.split(key, 10)

    def u(k, shape, fan_in):
        bound = 1.0 / float(fan_in) ** 0.5
        return jax.random.uniform(k, shape, jnp.float32, -bound, bound)

    return dict(
        w1=u(ks[0], (16, n_frames, 3, 3), n_frames * 9),
        b1=u(ks[1], (16,), n_frames * 9),
        w2=u(ks[2], (32, 16, 3, 3), 16 * 9),
        b2=u(ks[3], (32,), 16 * 9),
        wfc=u(ks[4], (64, 1152), 1152),
        bfc=u(ks[5], (64,), 1152),
        wa=u(ks[6], (n_actions, 64), 64),
        ba=u(ks[7], (n_actions,), 64),
        wv=u(ks[8], (1, 64), 64),
        bv=u(ks[9], (1,), 64),
    )


# ---------------------------------------------------------------------------
# Forward pass: one fused pallas_call, batch-tiled grid
# ---------------------------------------------------------------------------
@partial(jax.jit, static_argnames=("n_actions",))
def forward(x, prep, *, n_actions):
    B, H, W, C = x.shape
    wc = W * C
    a1, a2, wfc3 = prep["a1"], prep["a2"], prep["wfc3"]
    k1 = a1.shape[1]                 # padded x lane width (128)
    n1 = a1.shape[2]                 # conv1 out cols
    n2p = a2.shape[2]                # padded conv2 out cols
    oh2 = wfc3.shape[0]
    oh1 = oh2 + 2

    # Batch tile: multiple of 8 (sublane-clean reshapes), capped at _TB_CAP.
    tb = min(_TB_CAP, 8 * pl.cdiv(B, 8))
    bp = tb * pl.cdiv(B, tb)

    # Layout plumbing (cheap, outside the kernel): lane-pad W*C -> 128, pad the
    # batch to a multiple of tb, and transpose to (H, Bp, 128) so conv row
    # windows are contiguous tile-aligned slices inside the kernel.
    x2 = x.astype(jnp.float32).reshape(B, H, wc)
    x2 = jnp.pad(x2, ((0, bp - B), (0, 0), (0, k1 - wc)))
    xt = jnp.transpose(x2, (1, 0, 2))                       # (H, Bp, k1)

    out = pl.pallas_call(
        partial(_fused_kernel, tb=tb, oh1=oh1, oh2=oh2),
        out_shape=jax.ShapeDtypeStruct((bp, 128), jnp.float32),
        grid=(bp // tb,),
        in_specs=[
            pl.BlockSpec((H, tb, k1), lambda b: (0, b, 0)),        # x batch tile
            pl.BlockSpec(a1.shape, lambda b: (0, 0, 0)),           # conv1 taps
            pl.BlockSpec(prep["b1t"].shape, lambda b: (0, 0)),     # conv1 bias
            pl.BlockSpec(a2.shape, lambda b: (0, 0, 0)),           # conv2 taps
            pl.BlockSpec(prep["b2t"].shape, lambda b: (0, 0)),     # conv2 bias
            pl.BlockSpec(wfc3.shape, lambda b: (0, 0, 0)),         # FC trunk
            pl.BlockSpec(prep["bfc_p"].shape, lambda b: (0, 0)),   # FC bias
            pl.BlockSpec(prep["wh"].shape, lambda b: (0, 0)),      # fused heads W
            pl.BlockSpec(prep["bh"].shape, lambda b: (0, 0)),      # fused heads b
        ],
        out_specs=pl.BlockSpec((tb, 128), lambda b: (b, 0)),
        scratch_shapes=[pltpu.VMEM((oh1 * tb, n1), jnp.float32),   # h1 (h-major)
                        pltpu.VMEM((oh2 * tb, n2p), jnp.float32)], # h2 (h-major)
        compiler_params=pltpu.CompilerParams(
            dimension_semantics=("parallel",)),
    )(xt, a1, prep["b1t"], a2, prep["b2t"],
      wfc3, prep["bfc_p"], prep["wh"], prep["bh"])

    # The module's `outputs` gating returns both heads in the default config.
    return out[:B, :n_actions], out[:B, n_actions:n_actions + 1]


# ---------------------------------------------------------------------------
# Pure-JAX reference mirroring the PyTorch forward (NCHW convs)
# ---------------------------------------------------------------------------
def reference(x, p):
    xc = jnp.transpose(x.astype(jnp.float32), (0, 3, 1, 2))
    dn = ("NCHW", "OIHW", "NCHW")
    y = lax.conv_general_dilated(xc, p["w1"], (1, 1), "VALID", dimension_numbers=dn)
    y = jnp.maximum(y + p["b1"][None, :, None, None], 0.0)
    y = lax.conv_general_dilated(y, p["w2"], (1, 1), "VALID", dimension_numbers=dn)
    y = jnp.maximum(y + p["b2"][None, :, None, None], 0.0)
    flat = y.reshape(y.shape[0], -1)
    h = jnp.maximum(flat @ p["wfc"].T + p["bfc"], 0.0)
    return h @ p["wa"].T + p["ba"], h @ p["wv"].T + p["bv"]


if __name__ == "__main__":
    # Linear(1152, 64) implies 32*6*6 after two valid 3x3 convs -> board_size = 10.
    BOARD, N_FRAMES, N_ACTIONS = 10, 4, 4

    key = jax.random.PRNGKey(0)
    k_p, k_a, k_b = jax.random.split(key, 3)
    params = init_params(k_p, N_FRAMES, N_ACTIONS)

    # One-time weight re-layout (not part of the per-call hot path).
    prep = prepare_params(params, BOARD, N_ACTIONS)
    prep = jax.block_until_ready(prep)

    # Small batch (pads to one 8-sample step) and a larger batch that exercises
    # the multi-step batch-tiled grid (tb=128, 2 steps, padded tail).
    for B, kx in ((2, k_a), (200, k_b)):
        x = jax.random.uniform(kx, (B, BOARD, BOARD, N_FRAMES), jnp.float32)  # NHWC
        act, val = forward(x, prep, n_actions=N_ACTIONS)
        jax.block_until_ready((act, val))

        act_ref, val_ref = reference(x, params)
        assert act.shape == (B, N_ACTIONS) and val.shape == (B, 1)
        assert jnp.allclose(act, act_ref, atol=2e-4, rtol=2e-4)
        assert jnp.allclose(val, val_ref, atol=2e-4, rtol=2e-4)

    print("KERNEL_OK")
</pallas_src>

<mosaic_0001>
module attributes {stable_mosaic.version = 11 : i64} {
  func.func @_fused_kernel(%arg0: i32, %arg1: memref<10x8x128xf32, #tpu.memory_space<vmem>>, %arg2: memref<3x128x128xf32, #tpu.memory_space<vmem>>, %arg3: memref<1x128xf32, #tpu.memory_space<vmem>>, %arg4: memref<3x128x256xf32, #tpu.memory_space<vmem>>, %arg5: memref<1x256xf32, #tpu.memory_space<vmem>>, %arg6: memref<6x256x128xf32, #tpu.memory_space<vmem>>, %arg7: memref<1x128xf32, #tpu.memory_space<vmem>>, %arg8: memref<128x128xf32, #tpu.memory_space<vmem>>, %arg9: memref<1x128xf32, #tpu.memory_space<vmem>>, %arg10: memref<8x128xf32, #tpu.memory_space<vmem>>, %arg11: memref<64x128xf32, #tpu.memory_space<vmem>>, %arg12: memref<48x256xf32, #tpu.memory_space<vmem>>) attributes {dimension_semantics = [#tpu.dimension_semantics<parallel>], iteration_bounds = array<i64: 1>, scalar_prefetch = 0 : i64, scratch_operands = 2 : i64, tpu.core_type = #tpu.core_type<tc>, window_params = [{transform_indices = @transform_0, window_bounds = array<i64: 10, 8, 128>}, {pipeline_mode = #tpu.pipeline_mode<synchronous>, transform_indices = @transform_1, window_bounds = array<i64: 3, 128, 128>}, {pipeline_mode = #tpu.pipeline_mode<synchronous>, transform_indices = @transform_2, window_bounds = array<i64: 1, 128>}, {pipeline_mode = #tpu.pipeline_mode<synchronous>, transform_indices = @transform_3, window_bounds = array<i64: 3, 128, 256>}, {pipeline_mode = #tpu.pipeline_mode<synchronous>, transform_indices = @transform_4, window_bounds = array<i64: 1, 256>}, {pipeline_mode = #tpu.pipeline_mode<synchronous>, transform_indices = @transform_5, window_bounds = array<i64: 6, 256, 128>}, {pipeline_mode = #tpu.pipeline_mode<synchronous>, transform_indices = @transform_6, window_bounds = array<i64: 1, 128>}, {pipeline_mode = #tpu.pipeline_mode<synchronous>, transform_indices = @transform_7, window_bounds = array<i64: 128, 128>}, {pipeline_mode = #tpu.pipeline_mode<synchronous>, transform_indices = @transform_8, window_bounds = array<i64: 1, 128>}, {transform_indices = @transform_9, window_bounds = array<i64: 8, 128>}]} {
    %c0 = arith.constant 0 : index
    %c0_0 = arith.constant 0 : index
    %c0_1 = arith.constant 0 : index
    %0 = vector.load %arg1[%c0, %c0_0, %c0_1] : memref<10x8x128xf32, #tpu.memory_space<vmem>>, vector<8x8x128xf32>
    %1 = vector.shape_cast %0 : vector<8x8x128xf32> to vector<64x128xf32>
    %c0_2 = arith.constant 0 : index
    %c0_3 = arith.constant 0 : index
    %c0_4 = arith.constant 0 : index
    %2 = vector.load %arg2[%c0_2, %c0_3, %c0_4] : memref<3x128x128xf32, #tpu.memory_space<vmem>>, vector<1x128x128xf32>
    %3 = vector.shape_cast %2 : vector<1x128x128xf32> to vector<128x128xf32>
    %cst = arith.constant dense<0.000000e+00> : vector<64x128xf32>
    %4 = tpu.matmul %1, %3, %cst {dimension_numbers = #tpu.dot_dimension_numbers<[1], [0], [0], [1], [0, 0, 1, 1], [], []>} : vector<64x128xf32>, vector<128x128xf32>, vector<64x128xf32> -> vector<64x128xf32>
    %c1 = arith.constant 1 : index
    %c0_5 = arith.constant 0 : index
    %c0_6 = arith.constant 0 : index
    %5 = vector.load %arg1[%c1, %c0_5, %c0_6] : memref<10x8x128xf32, #tpu.memory_space<vmem>>, vector<8x8x128xf32>
    %6 = vector.shape_cast %5 : vector<8x8x128xf32> to vector<64x128xf32>
    %c1_7 = arith.constant 1 : index
    %c0_8 = arith.constant 0 : index
    %c0_9 = arith.constant 0 : index
    %7 = vector.load %arg2[%c1_7, %c0_8, %c0_9] : memref<3x128x128xf32, #tpu.memory_space<vmem>>, vector<1x128x128xf32>
    %8 = vector.shape_cast %7 : vector<1x128x128xf32> to vector<128x128xf32>
    %cst_10 = arith.constant dense<0.000000e+00> : vector<64x128xf32>
    %9 = tpu.matmul %6, %8, %cst_10 {dimension_numbers = #tpu.dot_dimension_numbers<[1], [0], [0], [1], [0, 0, 1, 1], [], []>} : vector<64x128xf32>, vector<128x128xf32>, vector<64x128xf32> -> vector<64x128xf32>
    %10 = arith.addf %4, %9 : vector<64x128xf32>
    %c2 = arith.constant 2 : index
    %c0_11 = arith.constant 0 : index
    %c0_12 = arith.constant 0 : index
    %11 = vector.load %arg1[%c2, %c0_11, %c0_12] : memref<10x8x128xf32, #tpu.memory_space<vmem>>, vector<8x8x128xf32>
    %12 = vector.shape_cast %11 : vector<8x8x128xf32> to vector<64x128xf32>
    %c2_13 = arith.constant 2 : index
    %c0_14 = arith.constant 0 : index
    %c0_15 = arith.constant 0 : index
    %13 = vector.load %arg2[%c2_13, %c0_14, %c0_15] : memref<3x128x128xf32, #tpu.memory_space<vmem>>, vector<1x128x128xf32>
    %14 = vector.shape_cast %13 : vector<1x128x128xf32> to vector<128x128xf32>
    %cst_16 = arith.constant dense<0.000000e+00> : vector<64x128xf32>
    %15 = tpu.matmul %12, %14, %cst_16 {dimension_numbers = #tpu.dot_dimension_numbers<[1], [0], [0], [1], [0, 0, 1, 1], [], []>} : vector<64x128xf32>, vector<128x128xf32>, vector<64x128xf32> -> vector<64x128xf32>
    %16 = arith.addf %10, %15 : vector<64x128xf32>
    %c0_17 = arith.constant 0 : index
    %c0_18 = arith.constant 0 : index
    %17 = vector.load %arg3[%c0_17, %c0_18] : memref<1x128xf32, #tpu.memory_space<vmem>>, vector<1x128xf32>
    %18 = vector.broadcast %17 : vector<1x128xf32> to vector<64x128xf32>
    %19 = arith.addf %16, %18 : vector<64x128xf32>
    %cst_19 = arith.constant 0.000000e+00 : f32
    %20 = vector.broadcast %cst_19 : f32 to vector<64x128xf32>
    %21 = arith.maximumf %19, %20 : vector<64x128xf32>
    %c0_20 = arith.constant 0 : index
    %c0_21 = arith.constant 0 : index
    %22 = vector.load %arg11[%c0_20, %c0_21] : memref<64x128xf32, #tpu.memory_space<vmem>>, vector<64x128xf32>
    tpu.vector_store %arg11[%c0_20, %c0_21], %21 {strides = array<i32>} : memref<64x128xf32, #tpu.memory_space<vmem>>, vector<64x128xf32>,
    %c0_22 = arith.constant 0 : index
    %c0_23 = arith.constant 0 : index
    %23 = vector.load %arg11[%c0_22, %c0_23] : memref<64x128xf32, #tpu.memory_space<vmem>>, vector<48x128xf32>
    %c0_24 = arith.constant 0 : index
    %c0_25 = arith.constant 0 : index
    %c0_26 = arith.constant 0 : index
    %24 = vector.load %arg4[%c0_24, %c0_25, %c0_26] : memref<3x128x256xf32, #tpu.memory_space<vmem>>, vector<1x128x256xf32>
    %25 = vector.shape_cast %24 : vector<1x128x256xf32> to vector<128x256xf32>
    %cst_27 = arith.constant dense<0.000000e+00> : vector<48x256xf32>
    %26 = tpu.matmul %23, %25, %cst_27 {dimension_numbers = #tpu.dot_dimension_numbers<[1], [0], [0], [1], [0, 0, 1, 1], [], []>} : vector<48x128xf32>, vector<128x256xf32>, vector<48x256xf32> -> vector<48x256xf32>
    %c8 = arith.constant 8 : index
    %c0_28 = arith.constant 0 : index
    %27 = vector.load %arg11[%c8, %c0_28] : memref<64x128xf32, #tpu.memory_space<vmem>>, vector<48x128xf32>
    %c1_29 = arith.constant 1 : index
    %c0_30 = arith.constant 0 : index
    %c0_31 = arith.constant 0 : index
    %28 = vector.load %arg4[%c1_29, %c0_30, %c0_31] : memref<3x128x256xf32, #tpu.memory_space<vmem>>, vector<1x128x256xf32>
    %29 = vector.shape_cast %28 : vector<1x128x256xf32> to vector<128x256xf32>
    %cst_32 = arith.constant dense<0.000000e+00> : vector<48x256xf32>
    %30 = tpu.matmul %27, %29, %cst_32 {dimension_numbers = #tpu.dot_dimension_numbers<[1], [0], [0], [1], [0, 0, 1, 1], [], []>} : vector<48x128xf32>, vector<128x256xf32>, vector<48x256xf32> -> vector<48x256xf32>
    %31 = arith.addf %26, %30 : vector<48x256xf32>
    %c16 = arith.constant 16 : index
    %c0_33 = arith.constant 0 : index
    %32 = vector.load %arg11[%c16, %c0_33] : memref<64x128xf32, #tpu.memory_space<vmem>>, vector<48x128xf32>
    %c2_34 = arith.constant 2 : index
    %c0_35 = arith.constant 0 : index
    %c0_36 = arith.constant 0 : index
    %33 = vector.load %arg4[%c2_34, %c0_35, %c0_36] : memref<3x128x256xf32, #tpu.memory_space<vmem>>, vector<1x128x256xf32>
    %34 = vector.shape_cast %33 : vector<1x128x256xf32> to vector<128x256xf32>
    %cst_37 = arith.constant dense<0.000000e+00> : vector<48x256xf32>
    %35 = tpu.matmul %32, %34, %cst_37 {dimension_numbers = #tpu.dot_dimension_numbers<[1], [0], [0], [1], [0, 0, 1, 1], [], []>} : vector<48x128xf32>, vector<128x256xf32>, vector<48x256xf32> -> vector<48x256xf32>
    %36 = arith.addf %31, %35 : vector<48x256xf32>
    %c0_38 = arith.constant 0 : index
    %c0_39 = arith.constant 0 : index
    %37 = vector.load %arg5[%c0_38, %c0_39] : memref<1x256xf32, #tpu.memory_space<vmem>>, vector<1x256xf32>
    %38 = vector.broadcast %37 : vector<1x256xf32> to vector<48x256xf32>
    %39 = arith.addf %36, %38 : vector<48x256xf32>
    %cst_40 = arith.constant 0.000000e+00 : f32
    %40 = vector.broadcast %cst_40 : f32 to vector<48x256xf32>
    %41 = arith.maximumf %39, %40 : vector<48x256xf32>
    %c0_41 = arith.constant 0 : index
    %c0_42 = arith.constant 0 : index
    %42 = vector.load %arg12[%c0_41, %c0_42] : memref<48x256xf32, #tpu.memory_space<vmem>>, vector<48x256xf32>
    tpu.vector_store %arg12[%c0_41, %c0_42], %41 {strides = array<i32>} : memref<48x256xf32, #tpu.memory_space<vmem>>, vector<48x256xf32>,
    %c0_43 = arith.constant 0 : index
    %c0_44 = arith.constant 0 : index
    %43 = vector.load %arg12[%c0_43, %c0_44] : memref<48x256xf32, #tpu.memory_space<vmem>>, vector<8x256xf32>
    %c0_45 = arith.constant 0 : index
    %c0_46 = arith.constant 0 : index
    %c0_47 = arith.constant 0 : index
    %44 = vector.load %arg6[%c0_45, %c0_46, %c0_47] : memref<6x256x128xf32, #tpu.memory_space<vmem>>, vector<1x256x128xf32>
    %45 = vector.shape_cast %44 : vector<1x256x128xf32> to vector<256x128xf32>
    %cst_48 = arith.constant dense<0.000000e+00> : vector<8x128xf32>
    %46 = tpu.matmul %43, %45, %cst_48 {dimension_numbers = #tpu.dot_dimension_numbers<[1], [0], [0], [1], [0, 0, 1, 1], [], []>} : vector<8x256xf32>, vector<256x128xf32>, vector<8x128xf32> -> vector<8x128xf32>
    %c8_49 = arith.constant 8 : index
    %c0_50 = arith.constant 0 : index
    %47 = vector.load %arg12[%c8_49, %c0_50] : memref<48x256xf32, #tpu.memory_space<vmem>>, vector<8x256xf32>
    %c1_51 = arith.constant 1 : index
    %c0_52 = arith.constant 0 : index
    %c0_53 = arith.constant 0 : index
    %48 = vector.load %arg6[%c1_51, %c0_52, %c0_53] : memref<6x256x128xf32, #tpu.memory_space<vmem>>, vector<1x256x128xf32>
    %49 = vector.shape_cast %48 : vector<1x256x128xf32> to vector<256x128xf32>
    %cst_54 = arith.constant dense<0.000000e+00> : vector<8x128xf32>
    %50 = tpu.matmul %47, %49, %cst_54 {dimension_numbers = #tpu.dot_dimension_numbers<[1], [0], [0], [1], [0, 0, 1, 1], [], []>} : vector<8x256xf32>, vector<256x128xf32>, vector<8x128xf32> -> vector<8x128xf32>
    %51 = arith.addf %46, %50 : vector<8x128xf32>
    %c16_55 = arith.constant 16 : index
    %c0_56 = arith.constant 0 : index
    %52 = vector.load %arg12[%c16_55, %c0_56] : memref<48x256xf32, #tpu.memory_space<vmem>>, vector<8x256xf32>
    %c2_57 = arith.constant 2 : index
    %c0_58 = arith.constant 0 : index
    %c0_59 = arith.constant 0 : index
    %53 = vector.load %arg6[%c2_57, %c0_58, %c0_59] : memref<6x256x128xf32, #tpu.memory_space<vmem>>, vector<1x256x128xf32>
    %54 = vector.shape_cast %53 : vector<1x256x128xf32> to vector<256x128xf32>
    %cst_60 = arith.constant dense<0.000000e+00> : vector<8x128xf32>
    %55 = tpu.matmul %52, %54, %cst_60 {dimension_numbers = #tpu.dot_dimension_numbers<[1], [0], [0], [1], [0, 0, 1, 1], [], []>} : vector<8x256xf32>, vector<256x128xf32>, vector<8x128xf32> -> vector<8x128xf32>
    %56 = arith.addf %51, %55 : vector<8x128xf32>
    %c24 = arith.constant 24 : index
    %c0_61 = arith.constant 0 : index
    %57 = vector.load %arg12[%c24, %c0_61] : memref<48x256xf32, #tpu.memory_space<vmem>>, vector<8x256xf32>
    %c3 = arith.constant 3 : index
    %c0_62 = arith.constant 0 : index
    %c0_63 = arith.constant 0 : index
    %58 = vector.load %arg6[%c3, %c0_62, %c0_63] : memref<6x256x128xf32, #tpu.memory_space<vmem>>, vector<1x256x128xf32>
    %59 = vector.shape_cast %58 : vector<1x256x128xf32> to vector<256x128xf32>
    %cst_64 = arith.constant dense<0.000000e+00> : vector<8x128xf32>
    %60 = tpu.matmul %57, %59, %cst_64 {dimension_numbers = #tpu.dot_dimension_numbers<[1], [0], [0], [1], [0, 0, 1, 1], [], []>} : vector<8x256xf32>, vector<256x128xf32>, vector<8x128xf32> -> vector<8x128xf32>
    %61 = arith.addf %56, %60 : vector<8x128xf32>
    %c32 = arith.constant 32 : index
    %c0_65 = arith.constant 0 : index
    %62 = vector.load %arg12[%c32, %c0_65] : memref<48x256xf32, #tpu.memory_space<vmem>>, vector<8x256xf32>
    %c4 = arith.constant 4 : index
    %c0_66 = arith.constant 0 : index
    %c0_67 = arith.constant 0 : index
    %63 = vector.load %arg6[%c4, %c0_66, %c0_67] : memref<6x256x128xf32, #tpu.memory_space<vmem>>, vector<1x256x128xf32>
    %64 = vector.shape_cast %63 : vector<1x256x128xf32> to vector<256x128xf32>
    %cst_68 = arith.constant dense<0.000000e+00> : vector<8x128xf32>
    %65 = tpu.matmul %62, %64, %cst_68 {dimension_numbers = #tpu.dot_dimension_numbers<[1], [0], [0], [1], [0, 0, 1, 1], [], []>} : vector<8x256xf32>, vector<256x128xf32>, vector<8x128xf32> -> vector<8x128xf32>
    %66 = arith.addf %61, %65 : vector<8x128xf32>
    %c40 = arith.constant 40 : index
    %c0_69 = arith.constant 0 : index
    %67 = vector.load %arg12[%c40, %c0_69] : memref<48x256xf32, #tpu.memory_space<vmem>>, vector<8x256xf32>
    %c5 = arith.constant 5 : index
    %c0_70 = arith.constant 0 : index
    %c0_71 = arith.constant 0 : index
    %68 = vector.load %arg6[%c5, %c0_70, %c0_71] : memref<6x256x128xf32, #tpu.memory_space<vmem>>, vector<1x256x128xf32>
    %69 = vector.shape_cast %68 : vector<1x256x128xf32> to vector<256x128xf32>
    %cst_72 = arith.constant dense<0.000000e+00> : vector<8x128xf32>
    %70 = tpu.matmul %67, %69, %cst_72 {dimension_numbers = #tpu.dot_dimension_numbers<[1], [0], [0], [1], [0, 0, 1, 1], [], []>} : vector<8x256xf32>, vector<256x128xf32>, vector<8x128xf32> -> vector<8x128xf32>
    %71 = arith.addf %66, %70 : vector<8x128xf32>
    %c0_73 = arith.constant 0 : index
    %c0_74 = arith.constant 0 : index
    %72 = vector.load %arg7[%c0_73, %c0_74] : memref<1x128xf32, #tpu.memory_space<vmem>>, vector<1x128xf32>
    %73 = vector.broadcast %72 : vector<1x128xf32> to vector<8x128xf32>
    %74 = arith.addf %71, %73 : vector<8x128xf32>
    %cst_75 = arith.constant 0.000000e+00 : f32
    %75 = vector.broadcast %cst_75 : f32 to vector<8x128xf32>
    %76 = arith.maximumf %74, %75 : vector<8x128xf32>
    %c0_76 = arith.constant 0 : index
    %c0_77 = arith.constant 0 : index
    %77 = vector.load %arg8[%c0_76, %c0_77] : memref<128x128xf32, #tpu.memory_space<vmem>>, vector<128x128xf32>
    %cst_78 = arith.constant dense<0.000000e+00> : vector<8x128xf32>
    %78 = tpu.matmul %76, %77, %cst_78 {dimension_numbers = #tpu.dot_dimension_numbers<[1], [0], [0], [1], [0, 0, 1, 1], [], []>} : vector<8x128xf32>, vector<128x128xf32>, vector<8x128xf32> -> vector<8x128xf32>
    %c0_79 = arith.constant 0 : index
    %c0_80 = arith.constant 0 : index
    %79 = vector.load %arg9[%c0_79, %c0_80] : memref<1x128xf32, #tpu.memory_space<vmem>>, vector<1x128xf32>
    %80 = vector.broadcast %79 : vector<1x128xf32> to vector<8x128xf32>
    %81 = arith.addf %78, %80 : vector<8x128xf32>
    %c0_81 = arith.constant 0 : index
    %c0_82 = arith.constant 0 : index
    %82 = vector.load %arg10[%c0_81, %c0_82] : memref<8x128xf32, #tpu.memory_space<vmem>>, vector<8x128xf32>
    tpu.vector_store %arg10[%c0_81, %c0_82], %81 {strides = array<i32>} : memref<8x128xf32, #tpu.memory_space<vmem>>, vector<8x128xf32>,
    return
  }
  func.func @transform_0(%arg0: i32) -> (i32, i32, i32) {
    %c0_i32 = arith.constant 0 : i32
    %c0_i32_0 = arith.constant 0 : i32
    %c0_i32_1 = arith.constant 0 : i32
    return %c0_i32, %arg0, %c0_i32_0 : i32, i32, i32
  }
  func.func @transform_1(%arg0: i32) -> (i32, i32, i32) {
    %c0_i32 = arith.constant 0 : i32
    %c0_i32_0 = arith.constant 0 : i32
    %c0_i32_1 = arith.constant 0 : i32
    %c0_i32_2 = arith.constant 0 : i32
    return %c0_i32, %c0_i32_0, %c0_i32_1 : i32, i32, i32
  }
  func.func @transform_2(%arg0: i32) -> (i32, i32) {
    %c0_i32 = arith.constant 0 : i32
    %c0_i32_0 = arith.constant 0 : i32
    %c0_i32_1 = arith.constant 0 : i32
    return %c0_i32, %c0_i32_0 : i32, i32
  }
  func.func @transform_3(%arg0: i32) -> (i32, i32, i32) {
    %c0_i32 = arith.constant 0 : i32
    %c0_i32_0 = arith.constant 0 : i32
    %c0_i32_1 = arith.constant 0 : i32
    %c0_i32_2 = arith.constant 0 : i32
    return %c0_i32, %c0_i32_0, %c0_i32_1 : i32, i32, i32
  }
  func.func @transform_4(%arg0: i32) -> (i32, i32) {
    %c0_i32 = arith.constant 0 : i32
    %c0_i32_0 = arith.constant 0 : i32
    %c0_i32_1 = arith.constant 0 : i32
    return %c0_i32, %c0_i32_0 : i32, i32
  }
  func.func @transform_5(%arg0: i32) -> (i32, i32, i32) {
    %c0_i32 = arith.constant 0 : i32
    %c0_i32_0 = arith.constant 0 : i32
    %c0_i32_1 = arith.constant 0 : i32
    %c0_i32_2 = arith.constant 0 : i32
    return %c0_i32, %c0_i32_0, %c0_i32_1 : i32, i32, i32
  }
  func.func @transform_6(%arg0: i32) -> (i32, i32) {
    %c0_i32 = arith.constant 0 : i32
    %c0_i32_0 = arith.constant 0 : i32
    %c0_i32_1 = arith.constant 0 : i32
    return %c0_i32, %c0_i32_0 : i32, i32
  }
  func.func @transform_7(%arg0: i32) -> (i32, i32) {
    %c0_i32 = arith.constant 0 : i32
    %c0_i32_0 = arith.constant 0 : i32
    %c0_i32_1 = arith.constant 0 : i32
    return %c0_i32, %c0_i32_0 : i32, i32
  }
  func.func @transform_8(%arg0: i32) -> (i32, i32) {
    %c0_i32 = arith.constant 0 : i32
    %c0_i32_0 = arith.constant 0 : i32
    %c0_i32_1 = arith.constant 0 : i32
    return %c0_i32, %c0_i32_0 : i32, i32
  }
  func.func @transform_9(%arg0: i32) -> (i32, i32) {
    %c0_i32 = arith.constant 0 : i32
    %c0_i32_0 = arith.constant 0 : i32
    return %arg0, %c0_i32 : i32, i32
  }
}

</mosaic_0001>

<bundles_post_ra>
// kernel: forward.1
= control target key start
LH: loop header
LB: loop body
LE: loop exit
PB: predicated region body
PF: predicated region fallthrough
CT: control target
= control target key end

     0   :  { %14 = vsyncpa [#allocation5], 0  ;;  %s2568_s0 = inlined_call_operand.vmem [shape: f32[10,8,128], index: 0, kind: input, shape index: {}]   ;;  %s2569_s1 = inlined_call_operand.hbm [shape: f32[3,128,128], index: 1, kind: input, shape index: {}]   ;;  %s2570_s2 = inlined_call_operand.vmem [shape: f32[1,128], index: 2, kind: input, shape index: {}]   ;;  %s2571_s3 = inlined_call_operand.hbm [shape: f32[3,128,256], index: 3, kind: input, shape index: {}]   ;;  %s2572_s4 = inlined_call_operand.vmem [shape: f32[1,256], index: 4, kind: input, shape index: {}]   ;;  %s2573_s5 = inlined_call_operand.hbm [shape: f32[6,256,128], index: 5, kind: input, shape index: {}]   ;;  %s2574_s6 = inlined_call_operand.vmem [shape: f32[1,128], index: 6, kind: input, shape index: {}]   ;;  %s2575_s7 = inlined_call_operand.vmem [shape: f32[128,128], index: 7, kind: input, shape index: {}]   ;;  %s2576_s8 = inlined_call_operand.vmem [shape: f32[1,128], index: 8, kind: input, shape index: {}]   ;;  %s2577_s9 = inlined_call_operand.vmem [shape: f32[8,128], index: 9, kind: output, shape index: {}]  }
   0x1   :  { %15 = vsyncpa [#allocation7], 0  ;;  %s2277_s30 = smov [#allocation6]  }
   0x2   :  { %s37_s10 = sshll.u32 %s2277_s30, 4  ;;  %s38_s10 = int_to_ptr.vmem [resolvable:$true] %s37_s10 }
   0x3   :  { %s2221_s11 = scalar_lea.vmem %s38_s10, 12288  ;;  %p2226_p1 = scmp.lt.s32.totalorder %s38_s10, %s38_s10 }
   0x4   :  { %p2222_p0 = scmp.ne.s32.totalorder %s38_s10, %s2221_s11  ;;  %p2227_p2 = scmp.lt.s32.totalorder %s2221_s11, %s2221_s11 }
   0x6   :  { %p2228_p3 = por %p2227_p2, %p2226_p1 }
   0x8   :  { %p2229_p4 = pnand %p2228_p3, %p2222_p0 }
   0xa   :  { %2232 = shalt.err (!%p2229_p4)
}
   0xb   :  { %s2278_s12 = smov 256   ;;  %s2279_s13 = smov 16  }
   0xc   :  { %43 = dma.hbm_to_vmem [thread:$0]  %s2571_s3, 12288, %s38_s10, [#allocation7], %s2278_s12, %s2278_s12, %s2279_s13  }
   0xd   :  { %s2280_s16 = smov [#allocation4]  }
   0xe   :  { %s23_s17 = sshll.u32 %s2280_s16, 4  ;;  %s24_s17 = int_to_ptr.vmem [resolvable:$true] %s23_s17 }
   0xf   :  { %s2241_s18 = scalar_lea.vmem %s24_s17, 6144  ;;  %p2246_p6 = scmp.lt.s32.totalorder %s24_s17, %s24_s17 }
  0x10   :  { %p2242_p5 = scmp.ne.s32.totalorder %s24_s17, %s2241_s18  ;;  %p2247_p7 = scmp.lt.s32.totalorder %s2241_s18, %s2241_s18 }
  0x12   :  { %p2248_p8 = por %p2247_p7, %p2246_p6 }
  0x14   :  { %p2249_p9 = pnand %p2248_p8, %p2242_p5 }
  0x16   :  { %2252 = shalt.err (!%p2249_p9)
}
  0x17   :  { %s2281_s19 = smov 128   ;;  %s2282_s20 = smov 8  }
  0x18   :  { %29 = dma.hbm_to_vmem [thread:$0]  %s2569_s1, 6144, %s24_s17, [#allocation5], %s2281_s19, %s2281_s19, %s2282_s20  }
  0x19   :  { %s2283_s23 = smov [#allocation8]  }
  0x1a   :  { %s51_s24 = sshll.u32 %s2283_s23, 4  ;;  %s52_s24 = int_to_ptr.vmem [resolvable:$true] %s51_s24 }
  0x1b   :  { %s2261_s3 = scalar_lea.vmem %s52_s24, 24576  ;;  %p2266_p11 = scmp.lt.s32.totalorder %s52_s24, %s52_s24 }
  0x1c   :  { %p2262_p10 = scmp.ne.s32.totalorder %s52_s24, %s2261_s3  ;;  %p2267_p12 = scmp.lt.s32.totalorder %s2261_s3, %s2261_s3 }
  0x1e   :  { %p2268_p13 = por %p2267_p12, %p2266_p11 }
  0x20   :  { %p2269_p0 = pnand %p2268_p13, %p2262_p10 }
  0x22   :  { %2272 = shalt.err (!%p2269_p0)
}
  0x23   :  { %57 = dma.hbm_to_vmem [thread:$0]  %s2573_s5, 24576, %s52_s24, [#allocation7], %s2281_s19, %s2281_s19, %s2282_s20  }
  0x24   :  { %2273 = dma.done.wait [#allocation5], 6144  }
  0x25   :  { %2274 = vsyncadd [#allocation5], 4294961152 }
  0x26   :  { %2275 = dma.done.wait [#allocation7], 36864  }
  0x27   :  { %2276 = vsyncadd [#allocation7], 4294930432  ;;  %v122_v0 = vld [vmem:[#allocation4 + $0xf8] sm:$0xff]  ;;  %v121_v2 = vld [vmem:[#allocation4 + $0xf0] sm:$0xff]  ;;  %vm2285_vm0 = vmmov 0  }
  0x28   :  { %v96_v1 = vld [vmem:[#allocation4 + $0x78] sm:$0xff]  ;;  %2037 = vmatprep.subr.mxu0 %v122_v0  ;;  %v95_v3 = vld [vmem:[#allocation4 + $0x70] sm:$0xff]  ;;  %v120_v4 = vld [vmem:[#allocation4 + $0xe8] sm:$0xff] }
  0x29   :  { %2081 = vmatprep.subr.mxu1 %v96_v1  ;;  %2038 = vmatpush3.msra.mxu0 %v122_v0  ;;  %v94_v5 = vld [vmem:[#allocation4 + $0x68] sm:$0xff]  ;;  %v119_v6 = vld [vmem:[#allocation4 + $0xe0] sm:$0xff]  ;;  %v118_v8 = vld [vmem:[#allocation4 + $0xd8] sm:$0xff] }
  0x2a   :  { %2082 = vmatpush3.msra.mxu1 %v96_v1  ;;  %2039 = vmatprep.subr.mxu0 %v121_v2  ;;  %v93_v7 = vld [vmem:[#allocation4 + $0x60] sm:$0xff]  ;;  %v92_v9 = vld [vmem:[#allocation4 + $0x58] sm:$0xff]  ;;  %v117_v10 = vld [vmem:[#allocation4 + $0xd0] sm:$0xff] }
  0x2b   :  { %2083 = vmatprep.subr.mxu1 %v95_v3  ;;  %2040 = vmatpush3.msra.mxu0 %v121_v2  ;;  %v91_v11 = vld [vmem:[#allocation4 + $0x50] sm:$0xff]  ;;  %v116_v12 = vld [vmem:[#allocation4 + $0xc8] sm:$0xff]  ;;  %v115_v14 = vld [vmem:[#allocation4 + $0xc0] sm:$0xff] }
  0x2c   :  { %2084 = vmatpush3.msra.mxu1 %v95_v3  ;;  %2041 = vmatprep.subr.mxu0 %v120_v4  ;;  %v90_v13 = vld [vmem:[#allocation4 + $0x48] sm:$0xff]  ;;  %v89_v15 = vld [vmem:[#allocation4 + $0x40] sm:$0xff]  ;;  %v114_v16 = vld [vmem:[#allocation4 + $0xb8] sm:$0xff] }
  0x2d   :  { %2085 = vmatprep.subr.mxu1 %v94_v5  ;;  %2042 = vmatpush3.msra.mxu0 %v120_v4  ;;  %v88_v17 = vld [vmem:[#allocation4 + $0x38] sm:$0xff]  ;;  %v113_v18 = vld [vmem:[#allocation4 + $0xb0] sm:$0xff]  ;;  %v112_v20 = vld [vmem:[#allocation4 + $0xa8] sm:$0xff] }
  0x2e   :  { %2086 = vmatpush3.msra.mxu1 %v94_v5  ;;  %2043 = vmatprep.subr.mxu0 %v119_v6  ;;  %v87_v19 = vld [vmem:[#allocation4 + $0x30] sm:$0xff]  ;;  %v86_v21 = vld [vmem:[#allocation4 + $0x28] sm:$0xff]  ;;  %v111_v22 = vld [vmem:[#allocation4 + $0xa0] sm:$0xff] }
  0x2f   :  { %2087 = vmatprep.subr.mxu1 %v93_v7  ;;  %2044 = vmatpush3.msra.mxu0 %v119_v6  ;;  %v85_v23 = vld [vmem:[#allocation4 + $0x20] sm:$0xff]  ;;  %v110_v24 = vld [vmem:[#allocation4 + $0x98] sm:$0xff]  ;;  %v109_v26 = vld [vmem:[#allocation4 + $0x90] sm:$0xff] }
  0x30   :  { %2088 = vmatpush3.msra.mxu1 %v93_v7  ;;  %2045 = vmatprep.subr.mxu0 %v118_v8  ;;  %v84_v25 = vld [vmem:[#allocation4 + $0x18] sm:$0xff]  ;;  %v83_v27 = vld [vmem:[#allocation4 + $0x10] sm:$0xff]  ;;  %v108_v28 = vld [vmem:[#allocation4 + $0x88] sm:$0xff] }
  0x31   :  { %2089 = vmatprep.subr.mxu1 %v92_v9  ;;  %2046 = vmatpush3.msra.mxu0 %v118_v8  ;;  %v82_v29 = vld [vmem:[#allocation4 + $0x8] sm:$0xff]  ;;  %v107_v30 = vld [vmem:[#allocation4 + $0x80] sm:$0xff]  ;;  %v1720_v34 = vld [vmem:[%s2568_s0 + $0x10] sm:$0xff] }
  0x32   :  { %2090 = vmatpush3.msra.mxu1 %v92_v9  ;;  %2047 = vmatprep.subr.mxu0 %v117_v10  ;;  %v81_v31 = vld [vmem:[#allocation4] sm:$0xff]  ;;  %v1719_v32 = vld [vmem:[%s2568_s0 + $0x8] sm:$0xff]  ;;  %v358_v35 = vld [vmem:[#allocation4 + $0x178] sm:$0xff] }
  0x33   :  { %2091 = vmatprep.subr.mxu1 %v91_v11  ;;  %2048 = vmatpush3.msra.mxu0 %v117_v10  ;;  %v73_v33 = vld [vmem:[%s2568_s0] sm:$0xff]  ;;  %v2357_v36 = vld [vmem:[%s2568_s0 + $0x18] sm:$0xff]  ;;  %v357_v37 = vld [vmem:[#allocation4 + $0x170] sm:$0xff] }
  0x34   :  { %2092 = vmatpush3.msra.mxu1 %v91_v11  ;;  %2049 = vmatprep.subr.mxu0 %v116_v12  ;;  %v356_v38 = vld [vmem:[#allocation4 + $0x168] sm:$0xff]  ;;  %v1722_v39 = vld [vmem:[%s2568_s0 + $0x20] sm:$0xff]  ;;  %v354_v42 = vld [vmem:[#allocation4 + $0x158] sm:$0xff] }
  0x35   :  { %2093 = vmatprep.subr.mxu1 %v90_v13  ;;  %2050 = vmatpush3.msra.mxu0 %v116_v12  ;;  %v1723_v40 = vld [vmem:[%s2568_s0 + $0x28] sm:$0xff]  ;;  %v355_v41 = vld [vmem:[#allocation4 + $0x160] sm:$0xff]  ;;  %v1724_v43 = vld [vmem:[%s2568_s0 + $0x30] sm:$0xff] }
  0x36   :  { %2094 = vmatpush3.msra.mxu1 %v90_v13  ;;  %2051 = vmatprep.subr.mxu0 %v115_v14  ;;  %v1725_v44 = vld [vmem:[%s2568_s0 + $0x38] sm:$0xff]  ;;  %v353_v45 = vld [vmem:[#allocation4 + $0x150] sm:$0xff]  ;;  %v352_v46 = vld [vmem:[#allocation4 + $0x148] sm:$0xff] }
  0x37   :  { %2095 = vmatprep.subr.mxu1 %v89_v15  ;;  %2052 = vmatpush3.msra.mxu0 %v115_v14  ;;  %v1726_v47 = vld [vmem:[%s2568_s0 + $0x40] sm:$0xff]  ;;  %v350_v49 = vld [vmem:[#allocation4 + $0x138] sm:$0xff]  ;;  %v349_v50 = vld [vmem:[#allocation4 + $0x130] sm:$0xff] }
  0x38   :  { %2096 = vmatpush3.msra.mxu1 %v89_v15  ;;  %2053 = vmatprep.subr.mxu0 %v114_v16  ;;  %v351_v48 = vld [vmem:[#allocation4 + $0x140] sm:$0xff]  ;;  %v348_v51 = vld [vmem:[#allocation4 + $0x128] sm:$0xff]  ;;  %v346_v53 = vld [vmem:[#allocation4 + $0x118] sm:$0xff] }
  0x39   :  { %2097 = vmatprep.subr.mxu1 %v88_v17  ;;  %2054 = vmatpush3.msra.mxu0 %v114_v16  ;;  %v347_v52 = vld [vmem:[#allocation4 + $0x120] sm:$0xff]  ;;  %v345_v54 = vld [vmem:[#allocation4 + $0x110] sm:$0xff]  ;;  %v344_v55 = vld [vmem:[#allocation4 + $0x108] sm:$0xff] }
  0x3a   :  { %2098 = vmatpush3.msra.mxu1 %v88_v17  ;;  %2055 = vmatprep.subr.mxu0 %v113_v18  ;;  %v343_v56 = vld [vmem:[#allocation4 + $0x100] sm:$0xff]  ;;  %v1734_v57 = vld [vmem:[%s2568_s0 + $0x48] sm:$0xff]  ;;  %v574_v58 = vld [vmem:[#allocation6 + $0x1f8] sm:$0xff] }
  0x3b   :  { %2099 = vmatprep.subr.mxu1 %v87_v19  ;;  %2056 = vmatpush3.msra.mxu0 %v113_v18  ;;  %v573_v59 = vld [vmem:[#allocation6 + $0x1f0] sm:$0xff]  ;;  %v572_v60 = vld [vmem:[#allocation6 + $0x1e8] sm:$0xff]  ;;  %v571_v61 = vld [vmem:[#allocation6 + $0x1e0] sm:$0xff] }
  0x3c   :  { %2100 = vmatpush3.msra.mxu1 %v87_v19  ;;  %2057 = vmatprep.subr.mxu0 %v112_v20  ;;  %v540_v62 = vld [vmem:[#allocation6 + $0xf8] sm:$0xff]  ;;  %v539_v0 = vld [vmem:[#allocation6 + $0xf0] sm:$0xff]  ;;  %v538_v1 = vld [vmem:[#allocation6 + $0xe8] sm:$0xff] }
  0x3d   :  { %2101 = vmatprep.subr.mxu1 %v86_v21  ;;  %2058 = vmatpush3.msra.mxu0 %v112_v20  ;;  %v570_v63 = vld [vmem:[#allocation6 + $0x1d8] sm:$0xff]  ;;  %v569_v2 = vld [vmem:[#allocation6 + $0x1d0] sm:$0xff]  ;;  %v537_v3 = vld [vmem:[#allocation6 + $0xe0] sm:$0xff] }
  0x3e   :  { %2102 = vmatpush3.msra.mxu1 %v86_v21  ;;  %2059 = vmatprep.subr.mxu0 %v111_v22  ;;  %v568_v4 = vld [vmem:[#allocation6 + $0x1c8] sm:$0xff]  ;;  %v536_v5 = vld [vmem:[#allocation6 + $0xd8] sm:$0xff]  ;;  %v535_v6 = vld [vmem:[#allocation6 + $0xd0] sm:$0xff] }
  0x3f   :  { %2103 = vmatprep.subr.mxu1 %v85_v23  ;;  %2060 = vmatpush3.msra.mxu0 %v111_v22  ;;  %v567_v7 = vld [vmem:[#allocation6 + $0x1c0] sm:$0xff]  ;;  %v534_v8 = vld [vmem:[#allocation6 + $0xc8] sm:$0xff]  ;;  %v566_v9 = vld [vmem:[#allocation6 + $0x1b8] sm:$0xff] }
  0x40   :  { %2104 = vmatpush3.msra.mxu1 %v85_v23  ;;  %2061 = vmatprep.subr.mxu0 %v110_v24  ;;  %v533_v10 = vld [vmem:[#allocation6 + $0xc0] sm:$0xff]  ;;  %v565_v11 = vld [vmem:[#allocation6 + $0x1b0] sm:$0xff]  ;;  %v532_v12 = vld [vmem:[#allocation6 + $0xb8] sm:$0xff] }
  0x41   :  { %2105 = vmatprep.subr.mxu1 %v84_v25  ;;  %2062 = vmatpush3.msra.mxu0 %v110_v24  ;;  %v564_v13 = vld [vmem:[#allocation6 + $0x1a8] sm:$0xff]  ;;  %v531_v14 = vld [vmem:[#allocation6 + $0xb0] sm:$0xff]  ;;  %v563_v15 = vld [vmem:[#allocation6 + $0x1a0] sm:$0xff] }
  0x42   :  { %2106 = vmatpush3.msra.mxu1 %v84_v25  ;;  %2063 = vmatprep.subr.mxu0 %v109_v26  ;;  %v530_v16 = vld [vmem:[#allocation6 + $0xa8] sm:$0xff]  ;;  %v562_v17 = vld [vmem:[#allocation6 + $0x198] sm:$0xff]  ;;  %v529_v18 = vld [vmem:[#allocation6 + $0xa0] sm:$0xff] }
  0x43   :  { %2107 = vmatprep.subr.mxu1 %v83_v27  ;;  %2064 = vmatpush3.msra.mxu0 %v109_v26  ;;  %v561_v19 = vld [vmem:[#allocation6 + $0x190] sm:$0xff]  ;;  %v528_v20 = vld [vmem:[#allocation6 + $0x98] sm:$0xff]  ;;  %v560_v21 = vld [vmem:[#allocation6 + $0x188] sm:$0xff] }
  0x44   :  { %2108 = vmatpush3.msra.mxu1 %v83_v27  ;;  %2065 = vmatprep.subr.mxu0 %v108_v28  ;;  %v527_v22 = vld [vmem:[#allocation6 + $0x90] sm:$0xff]  ;;  %v559_v23 = vld [vmem:[#allocation6 + $0x180] sm:$0xff]  ;;  %v526_v24 = vld [vmem:[#allocation6 + $0x88] sm:$0xff] }
  0x45   :  { %2109 = vmatprep.subr.mxu1 %v82_v29  ;;  %2066 = vmatpush3.msra.mxu0 %v108_v28  ;;  %v558_v25 = vld [vmem:[#allocation6 + $0x178] sm:$0xff]  ;;  %v525_v26 = vld [vmem:[#allocation6 + $0x80] sm:$0xff]  ;;  %v557_v27 = vld [vmem:[#allocation6 + $0x170] sm:$0xff] }
  0x46   :  { %2110 = vmatpush3.msra.mxu1 %v82_v29  ;;  %2067 = vmatprep.subr.mxu0 %v107_v30  ;;  %v524_v28 = vld [vmem:[#allocation6 + $0x78] sm:$0xff]  ;;  %v556_v29 = vld [vmem:[#allocation6 + $0x168] sm:$0xff] }
  0x47   :  { %2111 = vmatprep.subr.mxu1 %v81_v31  ;;  %2068 = vmatpush3.msra.mxu0 %v107_v30  ;;  %v523_v30 = vld [vmem:[#allocation6 + $0x70] sm:$0xff] }
  0x48   :  { %2069 = vmatprep.mubr.f32.mxu0 %v1719_v32  ;;  %2112 = vmatpush3.msra.mxu1 %v81_v31  ;;  %v555_v31 = vld [vmem:[#allocation6 + $0x160] sm:$0xff] }
  0x49   :  { %2113 = vmatprep.mubr.f32.mxu1 %v73_v33  ;;  %2070 = vmatmul.mubr.f32.vlgmr.msra.gmra.mxu0 %v1720_v34  ;;  %v554_v33 = vld [vmem:[#allocation6 + $0x158] sm:$0xff] }
  0x4a   :  { %2114 = vmatmul.mubr.f32.vlgmr.msra.gmra.mxu1 %v1719_v32  ;;  %2125 = vmatprep.subr.mxu0 %v358_v35  ;;  %v522_v32 = vld [vmem:[#allocation6 + $0x68] sm:$0xff] }
  0x4b   :  { %2072 = vmatprep.mubr.f32.mxu0 %v2357_v36  ;;  %2126 = vmatpush3.msra.mxu0 %v358_v35  ;;  %v553_v35 = vld [vmem:[#allocation6 + $0x150] sm:$0xff] }
  0x4c   :  { %2116 = vmatprep.mubr.f32.mxu1 %v1720_v34  ;;  %2127 = vmatprep.subr.mxu0 %v357_v37 }
  0x4d   :  { %2128 = vmatpush3.msra.mxu0 %v357_v37  ;;  %575 = vmatprep.subr.mxu1 %v574_v58  ;;  %v552_v37 = vld [vmem:[#allocation6 + $0x148] sm:$0xff] }
  0x4e   :  { %2117 = vmatmul.mubr.f32.gmra.mxu1 %v2357_v36  ;;  %2129 = vmatprep.subr.mxu0 %v356_v38  ;;  %v510_v58 = vld [vmem:[#allocation6 + $0x8] sm:$0xff] }
  0x4f   :  { %2073 = vmatmul.mubr.f32.gmra.mxu0 %v1722_v39  ;;  %2119 = vmatprep.mubr.f32.mxu1 %v1722_v39 }
  0x50   :  { %2130 = vmatpush3.msra.mxu0 %v356_v38  ;;  %2075 = vmatprep.mubr.f32.mxu0 %v1723_v40  ;;  %v519_v38 = vld [vmem:[#allocation6 + $0x50] sm:$0xff] }
  0x51   :  { %2131 = vmatprep.subr.mxu0 %v355_v41  ;;  %576 = vmatpush1.msra.mxu1 %v573_v59  ;;  %v509_v59 = vld [vmem:[#allocation6] sm:$0xff] }
  0x52   :  { %2132 = vmatpush3.msra.mxu0 %v355_v41  ;;  %2120 = vmatmul.mubr.f32.gmra.mxu1 %v1723_v40  ;;  %v550_v41 = vld [vmem:[#allocation6 + $0x138] sm:$0xff] }
  0x53   :  { %2133 = vmatprep.subr.mxu0 %v354_v42  ;;  %2076 = vmatmul.mubr.f32.gmra.mxu0 %v1724_v43 }
  0x54   :  { %2134 = vmatpush3.msra.mxu0 %v354_v42  ;;  %2078 = vmatprep.mubr.f32.mxu0 %v1725_v44  ;;  %v549_v42 = vld [vmem:[#allocation6 + $0x130] sm:$0xff] }
  0x55   :  { %2135 = vmatprep.subr.mxu0 %v353_v45  ;;  %2122 = vmatprep.mubr.f32.mxu1 %v1724_v43 }
  0x56   :  { %2136 = vmatpush3.msra.mxu0 %v353_v45  ;;  %2123 = vmatmul.mubr.f32.gmra.mxu1 %v1725_v44  ;;  %v547_v45 = vld [vmem:[#allocation6 + $0x120] sm:$0xff] }
  0x57   :  { %2137 = vmatprep.subr.mxu0 %v352_v46  ;;  %2079 = vmatmul.mubr.f32.gmra.mxu0 %v1726_v47 }
  0x58   :  { %2138 = vmatpush3.msra.mxu0 %v352_v46  ;;  %2157 = vmatprep.mubr.f32.mxu0 %v1720_v34  ;;  %v521_v34 = vld [vmem:[#allocation6 + $0x60] sm:$0xff]  ;;  %v516_v46 = vld [vmem:[#allocation6 + $0x38] sm:$0xff] }
  0x59   :  { %2139 = vmatprep.subr.mxu0 %v351_v48  ;;  %577 = vmatprep.subr.mxu1 %v572_v60 }
  0x5a   :  { %2140 = vmatpush3.msra.mxu0 %v351_v48  ;;  %578 = vmatpush1.msra.mxu1 %v571_v61  ;;  %v515_v48 = vld [vmem:[#allocation6 + $0x30] sm:$0xff] }
  0x5b   :  { %2141 = vmatprep.subr.mxu0 %v350_v49  ;;  %579 = vmatprep.subr.mxu1 %v570_v63 }
  0x5c   :  { %2142 = vmatpush3.msra.mxu0 %v350_v49  ;;  %580 = vmatpush1.msra.mxu1 %v569_v2  ;;  %v545_v49 = vld [vmem:[#allocation6 + $0x110] sm:$0xff] }
  0x5d   :  { %2143 = vmatprep.subr.mxu0 %v349_v50  ;;  %581 = vmatprep.subr.mxu1 %v568_v4 }
  0x5e   :  { %2144 = vmatpush3.msra.mxu0 %v349_v50  ;;  %582 = vmatpush1.msra.mxu1 %v567_v7  ;;  %v514_v50 = vld [vmem:[#allocation6 + $0x28] sm:$0xff] }
  0x5f   :  { %2145 = vmatprep.subr.mxu0 %v348_v51  ;;  %583 = vmatprep.subr.mxu1 %v566_v9 }
  0x60   :  { %2146 = vmatpush3.msra.mxu0 %v348_v51  ;;  %584 = vmatpush1.msra.mxu1 %v565_v11  ;;  %v544_v51 = vld [vmem:[#allocation6 + $0x108] sm:$0xff] }
  0x61   :  { %2147 = vmatprep.subr.mxu0 %v347_v52  ;;  %585 = vmatprep.subr.mxu1 %v564_v13 }
  0x62   :  { %2148 = vmatpush3.msra.mxu0 %v347_v52  ;;  %586 = vmatpush1.msra.mxu1 %v563_v15  ;;  %v513_v52 = vld [vmem:[#allocation6 + $0x20] sm:$0xff] }
  0x63   :  { %2149 = vmatprep.subr.mxu0 %v346_v53  ;;  %587 = vmatprep.subr.mxu1 %v562_v17 }
  0x64   :  { %2150 = vmatpush3.msra.mxu0 %v346_v53  ;;  %588 = vmatpush1.msra.mxu1 %v561_v19  ;;  %v543_v53 = vld [vmem:[#allocation6 + $0x100] sm:$0xff] }
  0x65   :  { %2151 = vmatprep.subr.mxu0 %v345_v54  ;;  %589 = vmatprep.subr.mxu1 %v560_v21 }
  0x66   :  { %2152 = vmatpush3.msra.mxu0 %v345_v54  ;;  %590 = vmatpush1.msra.mxu1 %v559_v23  ;;  %v512_v54 = vld [vmem:[#allocation6 + $0x18] sm:$0xff] }
  0x67   :  { %2153 = vmatprep.subr.mxu0 %v344_v55  ;;  %591 = vmatprep.subr.mxu1 %v558_v25  ;;  %v813_v25 = vld [vmem:[#allocation6 + $0x2e8] sm:$0xff] }
  0x68   :  { %2154 = vmatpush3.msra.mxu0 %v344_v55  ;;  %592 = vmatpush1.msra.mxu1 %v557_v27  ;;  %v511_v55 = vld [vmem:[#allocation6 + $0x10] sm:$0xff] }
  0x69   :  { %2155 = vmatprep.subr.mxu0 %v343_v56  ;;  %593 = vmatprep.subr.mxu1 %v556_v29  ;;  %v812_v29 = vld [vmem:[#allocation6 + $0x2e0] sm:$0xff] }
  0x6a   :  { %2156 = vmatpush3.msra.mxu0 %v343_v56  ;;  %594 = vmatpush1.msra.mxu1 %v555_v31  ;;  %v815_v56 = vld [vmem:[#allocation6 + $0x2f8] sm:$0xff] }
  0x6b   :  { %2158 = vmatmul.mubr.f32.vlgmr.msra.gmra.mxu0 %v2357_v36  ;;  %676 = vmatprep.subr.mxu0 %v540_v62  ;;  %v520_v36 = vld [vmem:[#allocation6 + $0x58] sm:$0xff] }
  0x6c   :  { %2160 = vmatprep.mubr.f32.mxu0 %v1722_v39  ;;  %677 = vmatpush1.msra.mxu0 %v539_v0  ;;  %v551_v39 = vld [vmem:[#allocation6 + $0x140] sm:$0xff]  ;;  %v811_v31 = vld [vmem:[#allocation6 + $0x2d8] sm:$0xff] }
  0x6d   :  { %678 = vmatprep.subr.mxu0 %v538_v1  ;;  %595 = vmatprep.subr.mxu1 %v554_v33 }
  0x6e   :  { %679 = vmatpush1.msra.mxu0 %v537_v3  ;;  %596 = vmatpush1.msra.mxu1 %v553_v35 }
  0x6f   :  { %2161 = vmatmul.mubr.f32.gmra.mxu0 %v1723_v40  ;;  %680 = vmatprep.subr.mxu0 %v536_v5  ;;  %v518_v40 = vld [vmem:[#allocation6 + $0x48] sm:$0xff] }
  0x70   :  { %2163 = vmatprep.mubr.f32.mxu0 %v1724_v43  ;;  %681 = vmatpush1.msra.mxu0 %v535_v6  ;;  %v548_v43 = vld [vmem:[#allocation6 + $0x128] sm:$0xff] }
  0x71   :  { %682 = vmatprep.subr.mxu0 %v534_v8  ;;  %597 = vmatprep.subr.mxu1 %v552_v37  ;;  %v809_v37 = vld [vmem:[#allocation6 + $0x2c8] sm:$0xff] }
  0x72   :  { %683 = vmatpush1.msra.mxu0 %v533_v10  ;;  %598 = vmatpush1.msra.mxu1 %v551_v39  ;;  %v2389_v10 = vld [vmem:[%s2570_s2] ss:$0 sm:$0xff] }
  0x73   :  { %2164 = vmatmul.mubr.f32.gmra.mxu0 %v1725_v44  ;;  %684 = vmatprep.subr.mxu0 %v532_v12  ;;  %v517_v44 = vld [vmem:[#allocation6 + $0x40] sm:$0xff] }
  0x74   :  { %2166 = vmatprep.mubr.f32.mxu0 %v1726_v47  ;;  %685 = vmatpush1.msra.mxu0 %v531_v14  ;;  %v546_v47 = vld [vmem:[#allocation6 + $0x118] sm:$0xff] }
  0x75   :  { %686 = vmatprep.subr.mxu0 %v530_v16  ;;  %599 = vmatprep.subr.mxu1 %v550_v41  ;;  %v808_v41 = vld [vmem:[#allocation6 + $0x2c0] sm:$0xff] }
  0x76   :  { %687 = vmatpush1.msra.mxu0 %v529_v18  ;;  %600 = vmatpush1.msra.mxu1 %v549_v42 }
  0x77   :  { %2167 = vmatmul.mubr.f32.gmra.mxu0 %v1734_v57  ;;  %688 = vmatprep.subr.mxu0 %v528_v20  ;;  %v2284_v57 = vmov 0.0  }
  0x78   :  { %689 = vmatpush1.msra.mxu0 %v527_v22  ;;  %601 = vmatprep.subr.mxu1 %v548_v43  ;;  %v814_v22 = vld [vmem:[#allocation6 + $0x2f0] sm:$0xff]  ;;  %v807_v43 = vld [vmem:[#allocation6 + $0x2b8] sm:$0xff] }
  0x79   :  { %690 = vmatprep.subr.mxu0 %v526_v24  ;;  %602 = vmatpush1.msra.mxu1 %v547_v45  ;;  %v806_v45 = vld [vmem:[#allocation6 + $0x2b0] sm:$0xff] }
  0x7a   :  { %691 = vmatpush1.msra.mxu0 %v525_v26  ;;  %603 = vmatprep.subr.mxu1 %v546_v47  ;;  %v805_v47 = vld [vmem:[#allocation6 + $0x2a8] sm:$0xff] }
  0x7b   :  { %692 = vmatprep.subr.mxu0 %v524_v28  ;;  %604 = vmatpush1.msra.mxu1 %v545_v49 }
  0x7c   :  { %693 = vmatpush1.msra.mxu0 %v523_v30  ;;  %605 = vmatprep.subr.mxu1 %v544_v51  ;;  %v804_v51 = vld [vmem:[#allocation6 + $0x2a0] sm:$0xff] }
  0x7d   :  { %694 = vmatprep.subr.mxu0 %v522_v32  ;;  %606 = vmatpush1.msra.mxu1 %v543_v53  ;;  %v803_v53 = vld [vmem:[#allocation6 + $0x298] sm:$0xff] }
  0x7e   :  { %695 = vmatpush1.msra.mxu0 %v521_v34  ;;  %639 = vmatprep.mubr.f32.mxu1 %v2284_v57  ;;  %v810_v34 = vld [vmem:[#allocation6 + $0x2d0] sm:$0xff] }
  0x7f   :  { %696 = vmatprep.subr.mxu0 %v520_v36  ;;  %816 = vmatprep.subr.mxu1 %v815_v56  ;;  %v801_v56 = vld [vmem:[#allocation6 + $0x288] sm:$0xff] }
  0x80   :  { %697 = vmatpush1.msra.mxu0 %v519_v38  ;;  %740 = vmatprep.mubr.f32.mxu0 %v2284_v57 }
  0x81   :  { %698 = vmatprep.subr.mxu0 %v518_v40 }
  0x82   :  { %699 = vmatpush1.msra.mxu0 %v517_v44 }
  0x83   :  { %700 = vmatprep.subr.mxu0 %v516_v46 }
  0x84   :  { %701 = vmatpush1.msra.mxu0 %v515_v48 }
  0x85   :  { %702 = vmatprep.subr.mxu0 %v514_v50 }
  0x86   :  { %703 = vmatpush1.msra.mxu0 %v513_v52 }
  0x87   :  { %704 = vmatprep.subr.mxu0 %v512_v54 }
  0x88   :  { %705 = vmatpush1.msra.mxu0 %v511_v55  ;;  %v802_v55 = vld [vmem:[#allocation6 + $0x290] sm:$0xff] }
  0x89   :  { %706 = vmatprep.subr.mxu0 %v510_v58 }
  0x8a   :  { %707 = vmatpush1.msra.mxu0 %v509_v59 }
 0x109   :  { %v2071_v60 = vpop.f32.mrf.mxu0 }
 0x10a   :  { %v2115_v1 = vpop.f32.mrf.mxu1 }
 0x10b   :  { %v189_v61 = vpop.f32.mrf.mxu0  ;;  %v300_v8 = vadd.f32 %v2115_v1, %v2071_v60 }
 0x10c   :  { %v294_v3 = vpop.f32.mrf.mxu1 }
 0x10d   :  { %v295_v11 = vadd.f32 %v294_v3, %v189_v61  ;;  %v800_v61 = vld [vmem:[#allocation6 + $0x280] sm:$0xff] }
 0x10e   :  { %v2118_v4 = vpop.f32.mrf.mxu1  ;;  %v796_v3 = vld [vmem:[#allocation6 + $0x260] sm:$0xff] }
 0x10f   :  { %v2074_v62 = vpop.f32.mrf.mxu0 }
 0x110   :  { %v304_v6 = vpop.f32.mrf.mxu1  ;;  %v310_v18 = vadd.f32 %v2118_v4, %v2074_v62  ;;  %v799_v62 = vld [vmem:[#allocation6 + $0x278] sm:$0xff] }
 0x111   :  { %v199_v63 = vpop.f32.mrf.mxu0  ;;  %v795_v4 = vld [vmem:[#allocation6 + $0x258] sm:$0xff] }
 0x112   :  { %v2121_v13 = vpop.f32.mrf.mxu1  ;;  %v305_v19 = vadd.f32 %v304_v6, %v199_v63  ;;  %v798_v63 = vld [vmem:[#allocation6 + $0x270] sm:$0xff] }
 0x113   :  { %v2077_v0 = vpop.f32.mrf.mxu0  ;;  %v794_v6 = vld [vmem:[#allocation6 + $0x250] sm:$0xff] }
 0x114   :  { %v314_v23 = vpop.f32.mrf.mxu1  ;;  %v320_v44 = vadd.f32 %v2121_v13, %v2077_v0  ;;  %v797_v0 = vld [vmem:[#allocation6 + $0x268] sm:$0xff] }
 0x115   :  { %v209_v2 = vpop.f32.mrf.mxu0  ;;  %v789_v13 = vld [vmem:[#allocation6 + $0x228] sm:$0xff] }
 0x116   :  { %v315_v32 = vadd.f32 %v314_v23, %v209_v2  ;;  %v2395_v35 = vpop.f32.mrf.mxu1  ;;  %v1010_v23 = vld [vmem:[#allocation8 + $0xf8] sm:$0xff] }
 0x117   :  { %v2382_v5 = vpop.f32.mrf.mxu0 }
 0x118   :  { %v324_v46 = vpop.f32.mrf.mxu1 }
 0x119   :  { %v2384_v7 = vpop.f32.mrf.mxu0 }
 0x11a   :  { %v325_v54 = vadd.f32 %v324_v46, %v2384_v7  ;;  %v793_v7 = vld [vmem:[#allocation6 + $0x248] sm:$0xff]  ;;  %v1003_v46 = vld [vmem:[#allocation8 + $0xc0] sm:$0xff] }
 0x12b   :  { %v2159_v9 = vpop.f32.mrf.mxu0 }
 0x12c   :  { %v465_v12 = vadd.f32 %v2159_v9, %v300_v8  ;;  %v792_v9 = vld [vmem:[#allocation6 + $0x240] sm:$0xff] }
 0x12d   :  { %v425_v14 = vpop.f32.mrf.mxu0 }
 0x12e   :  { %v480_v15 = vadd.f32 %v2389_v10, %v465_v12  ;;  %v464_v16 = vadd.f32 %v425_v14, %v295_v11  ;;  %v791_v11 = vld [vmem:[#allocation6 + $0x238] sm:$0xff]  ;;  %v790_v12 = vld [vmem:[#allocation6 + $0x230] sm:$0xff]  ;;  %v788_v14 = vld [vmem:[#allocation6 + $0x220] sm:$0xff] }
 0x12f   :  { %v2162_v17 = vpop.f32.mrf.mxu0 }
 0x130   :  { %v488_v20 = vmax.f32 %v480_v15, 0.0  ;;  %v479_v21 = vadd.f32 %v2389_v10, %v464_v16  ;;  %v467_v27 = vadd.f32 %v2162_v17, %v310_v18  ;;  %v787_v15 = vld [vmem:[#allocation6 + $0x218] sm:$0xff]  ;;  %v786_v16 = vld [vmem:[#allocation6 + $0x210] sm:$0xff]  ;;  %v785_v17 = vld [vmem:[#allocation6 + $0x208] sm:$0xff] }
 0x131   :  { %v435_v24 = vpop.f32.mrf.mxu0  ;;  %v784_v18 = vld [vmem:[#allocation6 + $0x200] sm:$0xff] }
 0x132   :  { %v487_v26 = vmax.f32 %v479_v21, 0.0  ;;  %v466_v28 = vadd.f32 %v435_v24, %v305_v19  ;;  %640 = vmatmul.mubr.f32.vlgmr.msra.gmra.mxu1 %v488_v20  ;;  %v482_v38 = vadd.f32 %v2389_v10, %v467_v27  ;;  %v330_v19 = vadd.f32 %v2395_v35, %v2382_v5  ;;  %v994_v24 = vld [vmem:[#allocation8 + $0x78] sm:$0xff]  ;;  %v1009_v5 = vld [vmem:[#allocation8 + $0xf0] sm:$0xff]  ;;  %v1008_v27 = vld [vmem:[#allocation8 + $0xe8] sm:$0xff] }
 0x133   :  { %817 = vmatpush1.msra.mxu1 %v814_v22  ;;  %v2165_v30 = vpop.f32.mrf.mxu0  ;;  %645 = vmatprep.mubr.f32.mxu1 %v2284_v57  ;;  %v1027_v35 = vld [vmem:[#allocation8 + $0x168] sm:$0xff] }
 0x134   :  { %v481_v33 = vadd.f32 %v2389_v10, %v466_v28  ;;  %818 = vmatprep.subr.mxu1 %v813_v25  ;;  %741 = vmatmul.mubr.f32.vlgmr.msra.gmra.mxu0 %v487_v26  ;;  %v2404_v48 = vmax.f32 %v482_v38, 0.0  ;;  %v469_v49 = vadd.f32 %v2165_v30, %v320_v44  ;;  %v993_v25 = vld [vmem:[#allocation8 + $0x70] sm:$0xff]  ;;  %v1045_v26 = vld [vmem:[#allocation8 + $0x1f8] sm:$0xff]  ;;  %v1007_v30 = vld [vmem:[#allocation8 + $0xe0] sm:$0xff] }
 0x135   :  { %819 = vmatpush1.msra.mxu1 %v812_v29  ;;  %v445_v36 = vpop.f32.mrf.mxu0  ;;  %746 = vmatprep.mubr.f32.mxu0 %v2284_v57  ;;  %v1029_v28 = vld [vmem:[#allocation8 + $0x178] sm:$0xff]  ;;  %v992_v29 = vld [vmem:[#allocation8 + $0x68] sm:$0xff]  ;;  %v1005_v38 = vld [vmem:[#allocation8 + $0xd0] sm:$0xff] }
 0x136   :  { %v2399_v39 = vmax.f32 %v481_v33, 0.0  ;;  %v468_v40 = vadd.f32 %v445_v36, %v315_v32  ;;  %820 = vmatprep.subr.mxu1 %v811_v31  ;;  %v484_v58 = vadd.f32 %v2389_v10, %v469_v49  ;;  %1810 = vmatprep.subr.mxu0 %v1045_v26  ;;  %v1028_v31 = vld [vmem:[#allocation8 + $0x170] sm:$0xff]  ;;  %v991_v32 = vld [vmem:[#allocation8 + $0x60] sm:$0xff]  ;;  %v1043_v33 = vld [vmem:[#allocation8 + $0x1e8] sm:$0xff] }
 0x137   :  { %821 = vmatpush1.msra.mxu1 %v810_v34  ;;  %v2401_v42 = vpop.f32.mrf.mxu0  ;;  %1811 = vmatpush3.msra.mxu0 %v1029_v28  ;;  %v1006_v34 = vld [vmem:[#allocation8 + $0xd8] sm:$0xff]  ;;  %v988_v44 = vld [vmem:[#allocation8 + $0x48] sm:$0xff] }
 0x138   :  { %822 = vmatprep.subr.mxu1 %v809_v37  ;;  %646 = vmatmul.mubr.f32.gmra.mxu1 %v2399_v39  ;;  %v483_v50 = vadd.f32 %v2389_v10, %v468_v40  ;;  %v492_v1 = vmax.f32 %v484_v58, 0.0  ;;  %v990_v36 = vld [vmem:[#allocation8 + $0x58] sm:$0xff]  ;;  %v1042_v37 = vld [vmem:[#allocation8 + $0x1e0] sm:$0xff]  ;;  %v989_v40 = vld [vmem:[#allocation8 + $0x50] sm:$0xff] }
 0x139   :  { %747 = vmatmul.mubr.f32.gmra.mxu0 %v488_v20  ;;  %823 = vmatpush1.msra.mxu1 %v808_v41  ;;  %v455_v52 = vpop.f32.mrf.mxu0  ;;  %v471_v20 = vadd.f32 %v2401_v42, %v330_v19  ;;  %v1041_v41 = vld [vmem:[#allocation8 + $0x1d8] sm:$0xff]  ;;  %v1004_v42 = vld [vmem:[#allocation8 + $0xc8] sm:$0xff]  ;;  %v979_v19 = vld [vmem:[#allocation8] sm:$0xff] }
 0x13a   :  { %824 = vmatprep.subr.mxu1 %v807_v43  ;;  %651 = vmatprep.mubr.f32.mxu1 %v2284_v57  ;;  %v491_v59 = vmax.f32 %v483_v50, 0.0  ;;  %v470_v60 = vadd.f32 %v455_v52, %v325_v54  ;;  %v1025_v43 = vld [vmem:[#allocation8 + $0x158] sm:$0xff]  ;;  %v1039_v49 = vld [vmem:[#allocation8 + $0x1c8] sm:$0xff]  ;;  %v1001_v54 = vld [vmem:[#allocation8 + $0xb0] sm:$0xff] }
 0x13b   :  { %825 = vmatpush1.msra.mxu1 %v806_v45  ;;  %752 = vmatprep.mubr.f32.mxu0 %v2284_v57  ;;  %v486_v21 = vadd.f32 %v2389_v10, %v471_v20  ;;  %v1040_v45 = vld [vmem:[#allocation8 + $0x1d0] sm:$0xff]  ;;  %v1002_v50 = vld [vmem:[#allocation8 + $0xb8] sm:$0xff]  ;;  %v1031_v20 = vld [vmem:[#allocation8 + $0x188] sm:$0xff] }
 0x13c   :  { %826 = vmatprep.subr.mxu1 %v805_v47  ;;  %652 = vmatmul.mubr.f32.gmra.mxu1 %v2404_v48  ;;  %v485_v2 = vadd.f32 %v2389_v10, %v470_v60  ;;  %v1044_v10 = vld [vmem:[#allocation8 + $0x1f0] sm:$0xff]  ;;  %v986_v52 = vld [vmem:[#allocation8 + $0x38] sm:$0xff] }
 0x13d   :  { %753 = vmatmul.mubr.f32.gmra.mxu0 %v2399_v39  ;;  %827 = vmatpush1.msra.mxu1 %v804_v51  ;;  %v494_v22 = vmax.f32 %v486_v21, 0.0  ;;  %v1024_v47 = vld [vmem:[#allocation8 + $0x150] sm:$0xff]  ;;  %v1023_v51 = vld [vmem:[#allocation8 + $0x148] sm:$0xff]  ;;  %v1037_v58 = vld [vmem:[#allocation8 + $0x1b8] sm:$0xff] }
 0x13e   :  { %828 = vmatprep.subr.mxu1 %v803_v53  ;;  %657 = vmatprep.mubr.f32.mxu1 %v2284_v57  ;;  %v493_v8 = vmax.f32 %v485_v2, 0.0  ;;  %v1038_v53 = vld [vmem:[#allocation8 + $0x1c0] sm:$0xff]  ;;  %v1021_v60 = vld [vmem:[#allocation8 + $0x138] sm:$0xff]  ;;  %v1035_v2 = vld [vmem:[#allocation8 + $0x1a8] sm:$0xff] }
 0x13f   :  { %829 = vmatpush1.msra.mxu1 %v802_v55  ;;  %758 = vmatprep.mubr.f32.mxu0 %v2284_v57  ;;  %v1022_v55 = vld [vmem:[#allocation8 + $0x140] sm:$0xff]  ;;  %v1326_v21 = vld [vmem:[#allocation8 + $0x3f8] sm:$0xff] }
 0x140   :  { %830 = vmatprep.subr.mxu1 %v801_v56  ;;  %658 = vmatmul.mubr.f32.gmra.mxu1 %v491_v59  ;;  %v985_v56 = vld [vmem:[#allocation8 + $0x30] sm:$0xff] }
 0x141   :  { %759 = vmatmul.mubr.f32.gmra.mxu0 %v2404_v48  ;;  %831 = vmatpush1.msra.mxu1 %v800_v61  ;;  %v984_v61 = vld [vmem:[#allocation8 + $0x28] sm:$0xff] }
 0x142   :  { %832 = vmatprep.subr.mxu1 %v799_v62  ;;  %663 = vmatprep.mubr.f32.mxu1 %v2284_v57  ;;  %v1036_v62 = vld [vmem:[#allocation8 + $0x1b0] sm:$0xff] }
 0x143   :  { %833 = vmatpush1.msra.mxu1 %v798_v63  ;;  %764 = vmatprep.mubr.f32.mxu0 %v2284_v57  ;;  %v999_v63 = vld [vmem:[#allocation8 + $0xa0] sm:$0xff] }
 0x144   :  { %834 = vmatprep.subr.mxu1 %v797_v0  ;;  %664 = vmatmul.mubr.f32.gmra.mxu1 %v492_v1  ;;  %v1020_v0 = vld [vmem:[#allocation8 + $0x130] sm:$0xff] }
 0x145   :  { %765 = vmatmul.mubr.f32.gmra.mxu0 %v491_v59  ;;  %835 = vmatpush1.msra.mxu1 %v796_v3  ;;  %v998_v3 = vld [vmem:[#allocation8 + $0x98] sm:$0xff] }
 0x146   :  { %836 = vmatprep.subr.mxu1 %v795_v4  ;;  %669 = vmatprep.mubr.f32.mxu1 %v2284_v57  ;;  %v1019_v4 = vld [vmem:[#allocation8 + $0x128] sm:$0xff] }
 0x147   :  { %837 = vmatpush1.msra.mxu1 %v794_v6  ;;  %770 = vmatprep.mubr.f32.mxu0 %v2284_v57  ;;  %v982_v6 = vld [vmem:[#allocation8 + $0x18] sm:$0xff] }
 0x148   :  { %838 = vmatprep.subr.mxu1 %v793_v7  ;;  %670 = vmatmul.mubr.f32.gmra.mxu1 %v493_v8  ;;  %v1034_v7 = vld [vmem:[#allocation8 + $0x1a0] sm:$0xff] }
 0x149   :  { %771 = vmatmul.mubr.f32.gmra.mxu0 %v492_v1  ;;  %839 = vmatpush1.msra.mxu1 %v792_v9  ;;  %v1018_v9 = vld [vmem:[#allocation8 + $0x120] sm:$0xff] }
 0x14a   :  { %840 = vmatprep.subr.mxu1 %v791_v11  ;;  %880 = vmatprep.mubr.f32.mxu1 %v2284_v57  ;;  %v981_v11 = vld [vmem:[#allocation8 + $0x10] sm:$0xff] }
 0x14b   :  { %841 = vmatpush1.msra.mxu1 %v790_v12  ;;  %1812 = vmatprep.subr.mxu0 %v1044_v10  ;;  %v1033_v12 = vld [vmem:[#allocation8 + $0x198] sm:$0xff] }
 0x14c   :  { %842 = vmatprep.subr.mxu1 %v789_v13  ;;  %1813 = vmatpush3.msra.mxu0 %v1028_v31  ;;  %v996_v13 = vld [vmem:[#allocation8 + $0x88] sm:$0xff] }
 0x14d   :  { %843 = vmatpush1.msra.mxu1 %v788_v14  ;;  %1814 = vmatprep.subr.mxu0 %v1043_v33  ;;  %v1017_v14 = vld [vmem:[#allocation8 + $0x118] sm:$0xff] }
 0x14e   :  { %844 = vmatprep.subr.mxu1 %v787_v15  ;;  %1815 = vmatpush3.msra.mxu0 %v1027_v35  ;;  %v980_v15 = vld [vmem:[#allocation8 + $0x8] sm:$0xff] }
 0x14f   :  { %845 = vmatpush1.msra.mxu1 %v786_v16  ;;  %1816 = vmatprep.subr.mxu0 %v1042_v37  ;;  %v1032_v16 = vld [vmem:[#allocation8 + $0x190] sm:$0xff]  ;;  %v931_v37 = vlaneseq }
 0x150   :  { %846 = vmatprep.subr.mxu1 %v785_v17  ;;  %v995_v17 = vld [vmem:[#allocation8 + $0x80] sm:$0xff] }
 0x151   :  { %847 = vmatpush1.msra.mxu1 %v784_v18  ;;  %v1016_v18 = vld [vmem:[#allocation8 + $0x110] sm:$0xff] }
 0x152   :  { %881 = vmatmul.mubr.f32.vlgmr.msra.gmra.mxu1 %v2399_v39  ;;  %1845 = vmatprep.subr.mxu1 %v1010_v23  ;;  %v1026_v39 = vld [vmem:[#allocation8 + $0x160] sm:$0xff] }
 0x153   :  { %886 = vmatprep.mubr.f32.mxu1 %v2284_v57  ;;  %1846 = vmatpush3.msra.mxu1 %v994_v24  ;;  %v1030_v23 = vld [vmem:[#allocation8 + $0x180] sm:$0xff] }
 0x154   :  { %1847 = vmatprep.subr.mxu1 %v1009_v5  ;;  %1817 = vmatpush3.msra.mxu0 %v1026_v39  ;;  %v1014_v24 = vld [vmem:[#allocation8 + $0x100] sm:$0xff]  ;;  %v1220_v5 = vld [vmem:[#allocation8 + $0x2f8] sm:$0xff] }
 0x155   :  { %1848 = vmatpush3.msra.mxu1 %v993_v25  ;;  %1818 = vmatprep.subr.mxu0 %v1041_v41 }
 0x156   :  { %887 = vmatmul.mubr.f32.gmra.mxu1 %v2404_v48  ;;  %1849 = vmatprep.subr.mxu1 %v1008_v27  ;;  %v987_v48 = vld [vmem:[#allocation8 + $0x40] sm:$0xff] }
 0x157   :  { %892 = vmatprep.mubr.f32.mxu1 %v2284_v57  ;;  %1850 = vmatpush3.msra.mxu1 %v992_v29 }
 0x158   :  { %1851 = vmatprep.subr.mxu1 %v1007_v30  ;;  %1819 = vmatpush3.msra.mxu0 %v1025_v43 }
 0x159   :  { %1852 = vmatpush3.msra.mxu1 %v991_v32  ;;  %1820 = vmatprep.subr.mxu0 %v1040_v45 }
 0x15a   :  { %893 = vmatmul.mubr.f32.gmra.mxu1 %v491_v59  ;;  %1853 = vmatprep.subr.mxu1 %v1006_v34  ;;  %v1000_v59 = vld [vmem:[#allocation8 + $0xa8] sm:$0xff] }
 0x15b   :  { %898 = vmatprep.mubr.f32.mxu1 %v2284_v57  ;;  %1854 = vmatpush3.msra.mxu1 %v990_v36 }
 0x15c   :  { %1855 = vmatprep.subr.mxu1 %v1005_v38  ;;  %1821 = vmatpush3.msra.mxu0 %v1024_v47 }
 0x15d   :  { %1856 = vmatpush3.msra.mxu1 %v989_v40  ;;  %1822 = vmatprep.subr.mxu0 %v1039_v49  ;;  %v932_v40 = vshrl.u32 %v931_v37, 7  ;;  %v1322_v37 = vld [vmem:[#allocation8 + $0x3d8] sm:$0xff] }
 0x15e   :  { %899 = vmatmul.mubr.f32.gmra.mxu1 %v492_v1  ;;  %1857 = vmatprep.subr.mxu1 %v1004_v42  ;;  %v983_v1 = vld [vmem:[#allocation8 + $0x20] sm:$0xff] }
 0x15f   :  { %904 = vmatprep.mubr.f32.mxu1 %v2284_v57  ;;  %1858 = vmatpush3.msra.mxu1 %v988_v44  ;;  %v933_v43 = vsub.s32 0, %v932_v40  ;;  %v929_v44 = vld [vmem:[%s2572_s4] sm:$0x3]  ;;  %v937_v45 = vsub.s32 1, %v932_v40  ;;  %v1202_v40 = vld [vmem:[#allocation8 + $0x268] sm:$0xff] }
 0x160   :  { %1859 = vmatprep.subr.mxu1 %v1003_v46  ;;  %1823 = vmatpush3.msra.mxu0 %v1023_v51 }
 0x161   :  { %1860 = vmatpush3.msra.mxu1 %v987_v48  ;;  %1824 = vmatprep.subr.mxu0 %v1038_v53  ;;  %v2454_v53 = vrot.slane %v929_v44, %v937_v45  ;;  %v1217_v45 = vld [vmem:[#allocation8 + $0x2e0] sm:$0xff] }
 0x162   :  { %905 = vmatmul.mubr.f32.gmra.mxu1 %v493_v8  ;;  %1861 = vmatprep.subr.mxu1 %v1002_v50  ;;  %v997_v8 = vld [vmem:[#allocation8 + $0x90] sm:$0xff]  ;;  %v2452_v50 = vrot.slane %v929_v44, %v933_v43  ;;  %v1306_v44 = vld [vmem:[#allocation8 + $0x358] sm:$0xff] }
 0x163   :  { %910 = vmatprep.mubr.f32.mxu1 %v2284_v57  ;;  %1862 = vmatpush3.msra.mxu1 %v986_v52 }
 0x164   :  { %1863 = vmatprep.subr.mxu1 %v1001_v54  ;;  %1825 = vmatpush3.msra.mxu0 %v1022_v55 }
 0x165   :  { %1864 = vmatpush3.msra.mxu1 %v985_v56  ;;  %1826 = vmatprep.subr.mxu0 %v1037_v58 }
 0x166   :  { %911 = vmatmul.mubr.f32.gmra.mxu1 %v494_v22  ;;  %1865 = vmatprep.subr.mxu1 %v1000_v59  ;;  %v1015_v22 = vld [vmem:[#allocation8 + $0x108] sm:$0xff] }
 0x167   :  { %1827 = vmatpush3.msra.mxu0 %v1021_v60  ;;  %1866 = vmatpush3.msra.mxu1 %v984_v61 }
 0x168   :  { %1828 = vmatprep.subr.mxu0 %v1036_v62  ;;  %1867 = vmatprep.subr.mxu1 %v999_v63 }
 0x169   :  { %1829 = vmatpush3.msra.mxu0 %v1020_v0  ;;  %1868 = vmatpush3.msra.mxu1 %v983_v1 }
 0x16a   :  { %1830 = vmatprep.subr.mxu0 %v1035_v2  ;;  %1869 = vmatprep.subr.mxu1 %v998_v3 }
 0x16b   :  { %1831 = vmatpush3.msra.mxu0 %v1019_v4  ;;  %1870 = vmatpush3.msra.mxu1 %v982_v6 }
 0x16c   :  { %1832 = vmatprep.subr.mxu0 %v1034_v7  ;;  %1871 = vmatprep.subr.mxu1 %v997_v8  ;;  %v1310_v8 = vld [vmem:[#allocation8 + $0x378] sm:$0xff] }
 0x16d   :  { %1833 = vmatpush3.msra.mxu0 %v1018_v9  ;;  %1872 = vmatpush3.msra.mxu1 %v981_v11 }
 0x16e   :  { %1834 = vmatprep.subr.mxu0 %v1033_v12  ;;  %1873 = vmatprep.subr.mxu1 %v996_v13  ;;  %v1325_v12 = vld [vmem:[#allocation8 + $0x3f0] sm:$0xff] }
 0x16f   :  { %1835 = vmatpush3.msra.mxu0 %v1017_v14  ;;  %1874 = vmatpush3.msra.mxu1 %v980_v15  ;;  %v1309_v14 = vld [vmem:[#allocation8 + $0x370] sm:$0xff] }
 0x170   :  { %1836 = vmatprep.subr.mxu0 %v1032_v16  ;;  %1875 = vmatprep.subr.mxu1 %v995_v17  ;;  %v1324_v17 = vld [vmem:[#allocation8 + $0x3e8] sm:$0xff] }
 0x171   :  { %1837 = vmatpush3.msra.mxu0 %v1016_v18  ;;  %1876 = vmatpush3.msra.mxu1 %v979_v19 }
 0x172   :  { %1838 = vmatprep.subr.mxu0 %v1031_v20  ;;  %1915 = vmatprep.subr.mxu1 %v1326_v21  ;;  %v1204_v21 = vld [vmem:[#allocation8 + $0x278] sm:$0xff] }
 0x173   :  { %1839 = vmatpush3.msra.mxu0 %v1015_v22  ;;  %v1308_v22 = vld [vmem:[#allocation8 + $0x368] sm:$0xff] }
 0x174   :  { %1840 = vmatprep.subr.mxu0 %v1030_v23 }
 0x175   :  { %1841 = vmatpush3.msra.mxu0 %v1014_v24 }
 0x176   :  { %1880 = vmatprep.subr.mxu0 %v1220_v5  ;;  %v1219_v5 = vld [vmem:[#allocation8 + $0x2f0] sm:$0xff] }
 0x1f2   :  { %v641_v25 = vpop.f32.mrf.mxu1 }
 0x1f4   :  { %v643_v26 = vpop.f32.mrf.mxu1  ;;  %v742_v28 = vpop.f32.mrf.mxu0 }
 0x1f5   :  { %v743_v47 = vadd.f32 %v742_v28, %v641_v25  ;;  %v1323_v25 = vld [vmem:[#allocation8 + $0x3e0] sm:$0xff] }
 0x1f6   :  { %v744_v30 = vpop.f32.mrf.mxu0  ;;  %v1307_v28 = vld [vmem:[#allocation8 + $0x360] sm:$0xff] }
 0x1f7   :  { %v745_v51 = vadd.f32 %v744_v30, %v643_v26 }
 0x1f8   :  { %v647_v27 = vpop.f32.mrf.mxu1 }
 0x1f9   :  { %v748_v33 = vpop.f32.mrf.mxu0 }
 0x1fa   :  { %v649_v29 = vpop.f32.mrf.mxu1  ;;  %v749_v55 = vadd.f32 %v748_v33, %v647_v27  ;;  %v1203_v27 = vld [vmem:[#allocation8 + $0x270] sm:$0xff]  ;;  %v1218_v33 = vld [vmem:[#allocation8 + $0x2e8] sm:$0xff] }
 0x1fb   :  { %v750_v36 = vpop.f32.mrf.mxu0 }
 0x1fc   :  { %v2433_v10 = vpop.f32.mrf.mxu1  ;;  %v751_v61 = vadd.f32 %v750_v36, %v649_v29 }
 0x1fd   :  { %v2441_v39 = vpop.f32.mrf.mxu0 }
 0x1fe   :  { %v655_v31 = vpop.f32.mrf.mxu1 }
 0x1ff   :  { %v756_v42 = vpop.f32.mrf.mxu0 }
 0x200   :  { %v2435_v32 = vpop.f32.mrf.mxu1  ;;  %v757_v9 = vadd.f32 %v756_v42, %v655_v31 }
 0x201   :  { %v2450_v48 = vpop.f32.mrf.mxu0 }
 0x202   :  { %v661_v34 = vpop.f32.mrf.mxu1 }
 0x203   :  { %v762_v58 = vpop.f32.mrf.mxu0 }
 0x204   :  { %v2437_v35 = vpop.f32.mrf.mxu1  ;;  %v763_v23 = vadd.f32 %v762_v58, %v661_v34 }
 0x205   :  { %v766_v3 = vpop.f32.mrf.mxu0 }
 0x206   :  { %v2439_v38 = vpop.f32.mrf.mxu1  ;;  %v767_v29 = vadd.f32 %v766_v3, %v2437_v35  ;;  %v1214_v3 = vld [vmem:[#allocation8 + $0x2c8] sm:$0xff] }
 0x207   :  { %v2462_v18 = vpop.f32.mrf.mxu0 }
 0x208   :  { %v2443_v41 = vpop.f32.mrf.mxu1 }
 0x209   :  { %v772_v36 = vpop.f32.mrf.mxu0 }
 0x20a   :  { %v2448_v46 = vpop.f32.mrf.mxu1 }
 0x212   :  { %v882_v49 = vpop.f32.mrf.mxu1 }
 0x213   :  { %v917_v52 = vadd.f32 %v882_v49, %v743_v47  ;;  %v1321_v47 = vld [vmem:[#allocation8 + $0x3d0] sm:$0xff]  ;;  %v1201_v49 = vld [vmem:[#allocation8 + $0x260] sm:$0xff] }
 0x214   :  { %v884_v54 = vpop.f32.mrf.mxu1 }
 0x215   :  { %v918_v56 = vadd.f32 %v884_v54, %v745_v51  ;;  %v941_v59 = vadd.f32 %v2452_v50, %v917_v52  ;;  %v773_v51 = vadd.f32 %v772_v36, %v2443_v41  ;;  %v1215_v41 = vld [vmem:[#allocation8 + $0x2d0] sm:$0xff]  ;;  %v1193_v36 = vld [vmem:[#allocation8 + $0x220] sm:$0xff] }
 0x216   :  { %v888_v60 = vpop.f32.mrf.mxu1 }
 0x217   :  { %v942_v62 = vadd.f32 %v2454_v53, %v918_v56  ;;  %v919_v63 = vadd.f32 %v888_v60, %v749_v55  ;;  %v953_v4 = vmax.f32 %v941_v59, 0.0  ;;  %v1305_v55 = vld [vmem:[#allocation8 + $0x350] sm:$0xff]  ;;  %v1216_v56 = vld [vmem:[#allocation8 + $0x2d8] sm:$0xff]  ;;  %v1320_v59 = vld [vmem:[#allocation8 + $0x3c8] sm:$0xff] }
 0x218   :  { %v890_v0 = vpop.f32.mrf.mxu1 }
 0x219   :  { %v954_v1 = vmax.f32 %v942_v62, 0.0  ;;  %v920_v2 = vadd.f32 %v890_v0, %v751_v61  ;;  %v943_v6 = vadd.f32 %v2452_v50, %v919_v63  ;;  %v1200_v61 = vld [vmem:[#allocation8 + $0x258] sm:$0xff]  ;;  %v1304_v62 = vld [vmem:[#allocation8 + $0x348] sm:$0xff]  ;;  %v1319_v63 = vld [vmem:[#allocation8 + $0x3c0] sm:$0xff] }
 0x21a   :  { %v2459_v7 = vpop.f32.mrf.mxu1 }
 0x21b   :  { %v944_v11 = vadd.f32 %v2454_v53, %v920_v2  ;;  %1180 = vmatprep.mubr.f32.mxu1 %v954_v1  ;;  %v955_v19 = vmax.f32 %v943_v6, 0.0  ;;  %v1199_v1 = vld [vmem:[#allocation8 + $0x250] sm:$0xff]  ;;  %v1303_v2 = vld [vmem:[#allocation8 + $0x340] sm:$0xff]  ;;  %v1198_v6 = vld [vmem:[#allocation8 + $0x248] sm:$0xff] }
 0x21c   :  { %v896_v13 = vpop.f32.mrf.mxu1  ;;  %1181 = vmatmul.mubr.f32.vlgmr.msra.gmra.mxu1 %v953_v4  ;;  %v1318_v4 = vld [vmem:[#allocation8 + $0x3b8] sm:$0xff] }
 0x21d   :  { %v956_v15 = vmax.f32 %v944_v11, 0.0  ;;  %v922_v16 = vadd.f32 %v896_v13, %v757_v9  ;;  %1916 = vmatpush3.msra.mxu1 %v1310_v8  ;;  %v1302_v8 = vld [vmem:[#allocation8 + $0x338] sm:$0xff]  ;;  %v1213_v9 = vld [vmem:[#allocation8 + $0x2c0] sm:$0xff]  ;;  %v1317_v11 = vld [vmem:[#allocation8 + $0x3b0] sm:$0xff] }
 0x21e   :  { %1917 = vmatprep.subr.mxu1 %v1325_v12  ;;  %v2464_v20 = vpop.f32.mrf.mxu1  ;;  %v1197_v12 = vld [vmem:[#allocation8 + $0x240] sm:$0xff]  ;;  %v1301_v13 = vld [vmem:[#allocation8 + $0x330] sm:$0xff] }
 0x21f   :  { %v946_v24 = vadd.f32 %v2454_v53, %v922_v16  ;;  %1918 = vmatpush3.msra.mxu1 %v1309_v14  ;;  %1110 = vmatprep.mubr.f32.mxu0 %v956_v15  ;;  %v1212_v14 = vld [vmem:[#allocation8 + $0x2b8] sm:$0xff]  ;;  %v1316_v15 = vld [vmem:[#allocation8 + $0x3a8] sm:$0xff] }
 0x220   :  { %1919 = vmatprep.subr.mxu1 %v1324_v17  ;;  %v902_v26 = vpop.f32.mrf.mxu1  ;;  %1111 = vmatmul.mubr.f32.vlgmr.msra.gmra.mxu0 %v955_v19  ;;  %v1196_v16 = vld [vmem:[#allocation8 + $0x238] sm:$0xff]  ;;  %v1300_v17 = vld [vmem:[#allocation8 + $0x328] sm:$0xff]  ;;  %v774_v19 = vpop.f32.mrf.mxu0 }
 0x221   :  { %v958_v30 = vmax.f32 %v946_v24, 0.0  ;;  %v924_v31 = vadd.f32 %v902_v26, %v763_v23  ;;  %1881 = vmatpush3.msra.mxu0 %v1204_v21  ;;  %1920 = vmatpush3.msra.mxu1 %v1308_v22  ;;  %v1211_v21 = vld [vmem:[#allocation8 + $0x2b0] sm:$0xff]  ;;  %v1315_v22 = vld [vmem:[#allocation8 + $0x3a0] sm:$0xff]  ;;  %v761_v23 = vadd.f32 %v2450_v48, %v2435_v32  ;;  %v1210_v26 = vld [vmem:[#allocation8 + $0x2a8] sm:$0xff] }
 0x222   :  { %1882 = vmatprep.subr.mxu0 %v1219_v5  ;;  %1921 = vmatprep.subr.mxu1 %v1323_v25  ;;  %v906_v34 = vpop.f32.mrf.mxu1  ;;  %v1195_v24 = vld [vmem:[#allocation8 + $0x230] sm:$0xff]  ;;  %v1299_v5 = vld [vmem:[#allocation8 + $0x320] sm:$0xff] }
 0x223   :  { %v948_v42 = vadd.f32 %v2454_v53, %v924_v31  ;;  %v925_v43 = vadd.f32 %v906_v34, %v767_v29  ;;  %1883 = vmatpush3.msra.mxu0 %v1203_v27  ;;  %1922 = vmatpush3.msra.mxu1 %v1307_v28  ;;  %v1314_v27 = vld [vmem:[#allocation8 + $0x398] sm:$0xff]  ;;  %v775_v28 = vadd.f32 %v774_v19, %v2448_v46  ;;  %v1209_v32 = vld [vmem:[#allocation8 + $0x2a0] sm:$0xff]  ;;  %v1313_v48 = vld [vmem:[#allocation8 + $0x390] sm:$0xff] }
 0x224   :  { %1884 = vmatprep.subr.mxu0 %v1218_v33  ;;  %1285 = vmatprep.mubr.f32.mxu0 %v958_v30  ;;  %v2469_v35 = vpop.f32.mrf.mxu1  ;;  %v923_v29 = vadd.f32 %v2464_v20, %v761_v23  ;;  %v1194_v30 = vld [vmem:[#allocation8 + $0x228] sm:$0xff]  ;;  %v1298_v31 = vld [vmem:[#allocation8 + $0x318] sm:$0xff]  ;;  %v1297_v34 = vld [vmem:[#allocation8 + $0x310] sm:$0xff] }
 0x225   :  { %v960_v52 = vmax.f32 %v948_v42, 0.0  ;;  %v2473_v54 = vadd.f32 %v2452_v50, %v925_v43  ;;  %1923 = vmatprep.subr.mxu1 %v1322_v37  ;;  %1885 = vmatpush3.msra.mxu0 %v1202_v40  ;;  %v755_v37 = vadd.f32 %v2441_v39, %v2433_v10  ;;  %v1208_v46 = vld [vmem:[#allocation8 + $0x298] sm:$0xff]  ;;  %v1312_v20 = vld [vmem:[#allocation8 + $0x388] sm:$0xff]  ;;  %v1191_v39 = vld [vmem:[#allocation8 + $0x210] sm:$0xff] }
 0x226   :  { %1924 = vmatpush3.msra.mxu1 %v1306_v44  ;;  %1886 = vmatprep.subr.mxu0 %v1217_v45  ;;  %v912_v58 = vpop.f32.mrf.mxu1  ;;  %v947_v40 = vadd.f32 %v2452_v50, %v923_v29  ;;  %v1192_v42 = vld [vmem:[#allocation8 + $0x218] sm:$0xff]  ;;  %v1296_v43 = vld [vmem:[#allocation8 + $0x308] sm:$0xff]  ;;  %v769_v44 = vadd.f32 %v2462_v18, %v2439_v38  ;;  %v1517_v19 = vld [vmem:[#allocation8 + $0x550] sm:$0xff] }
 0x227   :  { %1925 = vmatprep.subr.mxu1 %v1321_v47  ;;  %v927_v60 = vadd.f32 %v912_v58, %v773_v51  ;;  %1887 = vmatpush3.msra.mxu0 %v1201_v49  ;;  %v921_v45 = vadd.f32 %v2459_v7, %v755_v37  ;;  %v1207_v47 = vld [vmem:[#allocation8 + $0x290] sm:$0xff]  ;;  %v1311_v49 = vld [vmem:[#allocation8 + $0x380] sm:$0xff]  ;;  %v1538_v38 = vld [vmem:[#allocation8 + $0x5f8] sm:$0xff] }
 0x228   :  { %1926 = vmatpush3.msra.mxu1 %v1305_v55  ;;  %1888 = vmatprep.subr.mxu0 %v1216_v56  ;;  %v914_v25 = vpop.f32.mrf.mxu1  ;;  %v1295_v51 = vld [vmem:[#allocation8 + $0x300] sm:$0xff]  ;;  %v1206_v55 = vld [vmem:[#allocation8 + $0x288] sm:$0xff]  ;;  %v959_v56 = vmax.f32 %v947_v40, 0.0  ;;  %v1522_v58 = vld [vmem:[#allocation8 + $0x578] sm:$0xff] }
 0x229   :  { %v2476_v0 = vadd.f32 %v2452_v50, %v927_v60  ;;  %1927 = vmatprep.subr.mxu1 %v1320_v59  ;;  %1391 = vmatprep.mubr.f32.mxu1 %v960_v52  ;;  %v928_v33 = vadd.f32 %v914_v25, %v775_v28  ;;  %v926_v52 = vadd.f32 %v2469_v35, %v769_v44  ;;  %v1190_v7 = vld [vmem:[#allocation8 + $0x208] sm:$0xff]  ;;  %v1205_v60 = vld [vmem:[#allocation8 + $0x280] sm:$0xff]  ;;  %v1412_v23 = vld [vmem:[#allocation8 + $0x458] sm:$0xff] }
 0x22a   :  { %1889 = vmatpush3.msra.mxu0 %v1200_v61  ;;  %1928 = vmatpush3.msra.mxu1 %v1304_v62  ;;  %v945_v18 = vadd.f32 %v2452_v50, %v921_v45  ;;  %v1537_v61 = vld [vmem:[#allocation8 + $0x5f0] sm:$0xff]  ;;  %v1189_v62 = vld [vmem:[#allocation8 + $0x200] sm:$0xff]  ;;  %v1536_v50 = vld [vmem:[#allocation8 + $0x5e8] sm:$0xff] }
 0x22b   :  { %1890 = vmatprep.subr.mxu0 %v1215_v41  ;;  %1929 = vmatprep.subr.mxu1 %v1319_v63  ;;  %v952_v10 = vadd.f32 %v2454_v53, %v928_v33  ;;  %v950_v35 = vadd.f32 %v2454_v53, %v926_v52  ;;  %v1521_v41 = vld [vmem:[#allocation8 + $0x570] sm:$0xff]  ;;  %v1432_v63 = vld [vmem:[#allocation8 + $0x4f8] sm:$0xff]  ;;  %v1535_v53 = vld [vmem:[#allocation8 + $0x5e0] sm:$0xff] }
 0x22c   :  { %1891 = vmatpush3.msra.mxu0 %v1199_v1  ;;  %1930 = vmatpush3.msra.mxu1 %v1303_v2  ;;  %v957_v1 = vmax.f32 %v945_v18, 0.0  ;;  %v1416_v2 = vld [vmem:[#allocation8 + $0x478] sm:$0xff]  ;;  %v1531_v25 = vld [vmem:[#allocation8 + $0x5c0] sm:$0xff]  ;;  %v1426_v28 = vld [vmem:[#allocation8 + $0x4c8] sm:$0xff] }
 0x22d   :  { %1892 = vmatprep.subr.mxu0 %v1214_v3  ;;  %1931 = vmatprep.subr.mxu1 %v1318_v4  ;;  %v964_v59 = vmax.f32 %v952_v10, 0.0  ;;  %v1520_v3 = vld [vmem:[#allocation8 + $0x568] sm:$0xff]  ;;  %v962_v4 = vmax.f32 %v950_v35, 0.0  ;;  %v1530_v29 = vld [vmem:[#allocation8 + $0x5b8] sm:$0xff]  ;;  %v1409_v33 = vld [vmem:[#allocation8 + $0x440] sm:$0xff] }
 0x22e   :  { %1893 = vmatpush3.msra.mxu0 %v1198_v6  ;;  %1932 = vmatpush3.msra.mxu1 %v1302_v8  ;;  %v1431_v6 = vld [vmem:[#allocation8 + $0x4f0] sm:$0xff]  ;;  %v1528_v37 = vld [vmem:[#allocation8 + $0x5a8] sm:$0xff]  ;;  %v1511_v44 = vld [vmem:[#allocation8 + $0x520] sm:$0xff] }
 0x22f   :  { %1894 = vmatprep.subr.mxu0 %v1213_v9  ;;  %1933 = vmatprep.subr.mxu1 %v1317_v11  ;;  %v1415_v8 = vld [vmem:[#allocation8 + $0x470] sm:$0xff]  ;;  %v1519_v9 = vld [vmem:[#allocation8 + $0x560] sm:$0xff]  ;;  %v1430_v11 = vld [vmem:[#allocation8 + $0x4e8] sm:$0xff] }
 0x230   :  { %1895 = vmatpush3.msra.mxu0 %v1197_v12  ;;  %1934 = vmatpush3.msra.mxu1 %v1301_v13  ;;  %v1534_v12 = vld [vmem:[#allocation8 + $0x5d8] sm:$0xff]  ;;  %v1414_v13 = vld [vmem:[#allocation8 + $0x468] sm:$0xff]  ;;  %v1423_v40 = vld [vmem:[#allocation8 + $0x4b0] sm:$0xff] }
 0x231   :  { %1896 = vmatprep.subr.mxu0 %v1212_v14  ;;  %1935 = vmatprep.subr.mxu1 %v1316_v15  ;;  %v1518_v14 = vld [vmem:[#allocation8 + $0x558] sm:$0xff]  ;;  %v1429_v15 = vld [vmem:[#allocation8 + $0x4e0] sm:$0xff]  ;;  %v1422_v45 = vld [vmem:[#allocation8 + $0x4a8] sm:$0xff] }
 0x232   :  { %1897 = vmatpush3.msra.mxu0 %v1196_v16  ;;  %1936 = vmatpush3.msra.mxu1 %v1300_v17  ;;  %v1533_v16 = vld [vmem:[#allocation8 + $0x5d0] sm:$0xff]  ;;  %v1413_v17 = vld [vmem:[#allocation8 + $0x460] sm:$0xff]  ;;  %v1510_v10 = vld [vmem:[#allocation8 + $0x518] sm:$0xff] }
 0x233   :  { %1898 = vmatprep.subr.mxu0 %v1211_v21  ;;  %1937 = vmatprep.subr.mxu1 %v1315_v22  ;;  %v1428_v21 = vld [vmem:[#allocation8 + $0x4d8] sm:$0xff]  ;;  %v1532_v22 = vld [vmem:[#allocation8 + $0x5c8] sm:$0xff]  ;;  %v1405_v52 = vld [vmem:[#allocation8 + $0x420] sm:$0xff] }
 0x234   :  { %1899 = vmatpush3.msra.mxu0 %v1195_v24  ;;  %1938 = vmatpush3.msra.mxu1 %v1299_v5  ;;  %v1516_v24 = vld [vmem:[#allocation8 + $0x548] sm:$0xff]  ;;  %v1427_v5 = vld [vmem:[#allocation8 + $0x4d0] sm:$0xff] }
 0x235   :  { %1900 = vmatprep.subr.mxu0 %v1210_v26  ;;  %1939 = vmatprep.subr.mxu1 %v1314_v27  ;;  %v1411_v26 = vld [vmem:[#allocation8 + $0x450] sm:$0xff]  ;;  %v1515_v27 = vld [vmem:[#allocation8 + $0x540] sm:$0xff]  ;;  %v1508_v18 = vld [vmem:[#allocation8 + $0x508] sm:$0xff] }
 0x236   :  { %1901 = vmatpush3.msra.mxu0 %v1194_v30  ;;  %1940 = vmatpush3.msra.mxu1 %v1298_v31  ;;  %v1410_v30 = vld [vmem:[#allocation8 + $0x448] sm:$0xff]  ;;  %v1514_v31 = vld [vmem:[#allocation8 + $0x538] sm:$0xff] }
 0x237   :  { %1902 = vmatprep.subr.mxu0 %v1209_v32  ;;  %1941 = vmatprep.subr.mxu1 %v1313_v48  ;;  %v1425_v32 = vld [vmem:[#allocation8 + $0x4c0] sm:$0xff]  ;;  %v1529_v48 = vld [vmem:[#allocation8 + $0x5b0] sm:$0xff]  ;;  %v1418_v35 = vld [vmem:[#allocation8 + $0x488] sm:$0xff] }
 0x238   :  { %1903 = vmatpush3.msra.mxu0 %v1193_v36  ;;  %1942 = vmatpush3.msra.mxu1 %v1297_v34  ;;  %v1513_v36 = vld [vmem:[#allocation8 + $0x530] sm:$0xff]  ;;  %v1424_v34 = vld [vmem:[#allocation8 + $0x4b8] sm:$0xff] }
 0x239   :  { %1904 = vmatprep.subr.mxu0 %v1208_v46  ;;  %1943 = vmatprep.subr.mxu1 %v1312_v20  ;;  %v1408_v46 = vld [vmem:[#allocation8 + $0x438] sm:$0xff]  ;;  %v1512_v20 = vld [vmem:[#allocation8 + $0x528] sm:$0xff] }
 0x23a   :  { %1905 = vmatpush3.msra.mxu0 %v1192_v42  ;;  %1944 = vmatpush3.msra.mxu1 %v1296_v43  ;;  %v1527_v42 = vld [vmem:[#allocation8 + $0x5a0] sm:$0xff]  ;;  %v1407_v43 = vld [vmem:[#allocation8 + $0x430] sm:$0xff] }
 0x23b   :  { %1906 = vmatprep.subr.mxu0 %v1207_v47  ;;  %1945 = vmatprep.subr.mxu1 %v1311_v49  ;;  %v1526_v47 = vld [vmem:[#allocation8 + $0x598] sm:$0xff]  ;;  %v1406_v49 = vld [vmem:[#allocation8 + $0x428] sm:$0xff] }
 0x23c   :  { %1907 = vmatpush3.msra.mxu0 %v1191_v39  ;;  %1946 = vmatpush3.msra.mxu1 %v1295_v51  ;;  %v1421_v39 = vld [vmem:[#allocation8 + $0x4a0] sm:$0xff]  ;;  %v1525_v51 = vld [vmem:[#allocation8 + $0x590] sm:$0xff] }
 0x23d   :  { %1908 = vmatprep.subr.mxu0 %v1206_v55  ;;  %1392 = vmatmul.mubr.f32.vlgmr.msra.gmra.mxu1 %v959_v56  ;;  %v1509_v55 = vld [vmem:[#allocation8 + $0x510] sm:$0xff]  ;;  %v1420_v56 = vld [vmem:[#allocation8 + $0x498] sm:$0xff] }
 0x23e   :  { %1985 = vmatprep.subr.mxu1 %v1538_v38  ;;  %1909 = vmatpush3.msra.mxu0 %v1190_v7  ;;  %v1524_v38 = vld [vmem:[#allocation8 + $0x588] sm:$0xff]  ;;  %v1404_v7 = vld [vmem:[#allocation8 + $0x418] sm:$0xff] }
 0x23f   :  { %1986 = vmatpush3.msra.mxu1 %v1522_v58  ;;  %1603 = vmatprep.mubr.f32.mxu1 %v964_v59  ;;  %v1419_v58 = vld [vmem:[#allocation8 + $0x490] sm:$0xff]  ;;  %v1523_v59 = vld [vmem:[#allocation8 + $0x580] sm:$0xff] }
 0x240   :  { %1910 = vmatprep.subr.mxu0 %v1205_v60  ;;  %1987 = vmatprep.subr.mxu1 %v1537_v61  ;;  %v1403_v60 = vld [vmem:[#allocation8 + $0x410] sm:$0xff]  ;;  %v1507_v61 = vld [vmem:[#allocation8 + $0x500] sm:$0xff] }
 0x241   :  { %1911 = vmatpush3.msra.mxu0 %v1189_v62  ;;  %1988 = vmatpush3.msra.mxu1 %v1521_v41  ;;  %v963_v62 = vmax.f32 %v2476_v0, 0.0  ;;  %v1402_v41 = vld [vmem:[#allocation8 + $0x408] sm:$0xff]  ;;  %v1634_v0 = vld [vmem:[%s2575_s7 + $0x78] sm:$0xff] }
 0x242   :  { %1286 = vmatmul.mubr.f32.vlgmr.msra.gmra.mxu0 %v957_v1  ;;  %1950 = vmatprep.subr.mxu0 %v1432_v63  ;;  %v1417_v63 = vld [vmem:[#allocation8 + $0x480] sm:$0xff] }
 0x243   :  { %1989 = vmatprep.subr.mxu1 %v1536_v50  ;;  %1951 = vmatpush3.msra.mxu0 %v1416_v2  ;;  %v1401_v1 = vld [vmem:[#allocation8 + $0x400] sm:$0xff]  ;;  %v961_v50 = vmax.f32 %v2473_v54, 0.0  ;;  %v1633_v2 = vld [vmem:[%s2575_s7 + $0x70] sm:$0xff]  ;;  %v1632_v54 = vld [vmem:[%s2575_s7 + $0x68] sm:$0xff] }
 0x244   :  { %1497 = vmatprep.mubr.f32.mxu0 %v962_v4  ;;  %1990 = vmatpush3.msra.mxu1 %v1520_v3  ;;  %v1631_v3 = vld [vmem:[%s2575_s7 + $0x60] sm:$0xff]  ;;  %v1630_v4 = vld [vmem:[%s2575_s7 + $0x58] sm:$0xff] }
 0x245   :  { %1952 = vmatprep.subr.mxu0 %v1431_v6  ;;  %1991 = vmatprep.subr.mxu1 %v1535_v53  ;;  %v1629_v6 = vld [vmem:[%s2575_s7 + $0x50] sm:$0xff]  ;;  %v1628_v53 = vld [vmem:[%s2575_s7 + $0x48] sm:$0xff] }
 0x246   :  { %1953 = vmatpush3.msra.mxu0 %v1415_v8  ;;  %1992 = vmatpush3.msra.mxu1 %v1519_v9  ;;  %v1627_v8 = vld [vmem:[%s2575_s7 + $0x40] sm:$0xff]  ;;  %v1626_v9 = vld [vmem:[%s2575_s7 + $0x38] sm:$0xff] }
 0x247   :  { %1954 = vmatprep.subr.mxu0 %v1430_v11  ;;  %1993 = vmatprep.subr.mxu1 %v1534_v12  ;;  %v1625_v11 = vld [vmem:[%s2575_s7 + $0x30] sm:$0xff]  ;;  %v1624_v12 = vld [vmem:[%s2575_s7 + $0x28] sm:$0xff] }
 0x248   :  { %1955 = vmatpush3.msra.mxu0 %v1414_v13  ;;  %1994 = vmatpush3.msra.mxu1 %v1518_v14  ;;  %v1623_v13 = vld [vmem:[%s2575_s7 + $0x20] sm:$0xff]  ;;  %v1622_v14 = vld [vmem:[%s2575_s7 + $0x18] sm:$0xff] }
 0x249   :  { %1956 = vmatprep.subr.mxu0 %v1429_v15  ;;  %1995 = vmatprep.subr.mxu1 %v1533_v16  ;;  %v1621_v15 = vld [vmem:[%s2575_s7 + $0x10] sm:$0xff]  ;;  %v1620_v16 = vld [vmem:[%s2575_s7 + $0x8] sm:$0xff] }
 0x24a   :  { %1957 = vmatpush3.msra.mxu0 %v1413_v17  ;;  %1996 = vmatpush3.msra.mxu1 %v1517_v19  ;;  %v1619_v17 = vld [vmem:[%s2575_s7] sm:$0xff] }
 0x24b   :  { %1958 = vmatprep.subr.mxu0 %v1428_v21  ;;  %1997 = vmatprep.subr.mxu1 %v1532_v22 }
 0x24c   :  { %1959 = vmatpush3.msra.mxu0 %v1412_v23  ;;  %1998 = vmatpush3.msra.mxu1 %v1516_v24 }
 0x24d   :  { %1960 = vmatprep.subr.mxu0 %v1427_v5  ;;  %1999 = vmatprep.subr.mxu1 %v1531_v25 }
 0x24e   :  { %1961 = vmatpush3.msra.mxu0 %v1411_v26  ;;  %2000 = vmatpush3.msra.mxu1 %v1515_v27 }
 0x24f   :  { %1962 = vmatprep.subr.mxu0 %v1426_v28  ;;  %2001 = vmatprep.subr.mxu1 %v1530_v29 }
 0x250   :  { %1963 = vmatpush3.msra.mxu0 %v1410_v30  ;;  %2002 = vmatpush3.msra.mxu1 %v1514_v31 }
 0x251   :  { %1964 = vmatprep.subr.mxu0 %v1425_v32  ;;  %2003 = vmatprep.subr.mxu1 %v1529_v48 }
 0x252   :  { %1965 = vmatpush3.msra.mxu0 %v1409_v33  ;;  %2004 = vmatpush3.msra.mxu1 %v1513_v36 }
 0x253   :  { %1966 = vmatprep.subr.mxu0 %v1424_v34  ;;  %2005 = vmatprep.subr.mxu1 %v1528_v37 }
 0x254   :  { %1967 = vmatpush3.msra.mxu0 %v1408_v46  ;;  %2006 = vmatpush3.msra.mxu1 %v1512_v20 }
 0x255   :  { %1968 = vmatprep.subr.mxu0 %v1423_v40  ;;  %2007 = vmatprep.subr.mxu1 %v1527_v42  ;;  %v1736_v40 = vld [vmem:[%s2574_s6] ss:$0 sm:$0xff] }
 0x256   :  { %1969 = vmatpush3.msra.mxu0 %v1407_v43  ;;  %2008 = vmatpush3.msra.mxu1 %v1511_v44 }
 0x257   :  { %1970 = vmatprep.subr.mxu0 %v1422_v45  ;;  %2009 = vmatprep.subr.mxu1 %v1526_v47  ;;  %v1737_v45 = vld [vmem:[%s2576_s8] ss:$0 sm:$0xff] }
 0x258   :  { %1971 = vmatpush3.msra.mxu0 %v1406_v49  ;;  %2010 = vmatpush3.msra.mxu1 %v1510_v10 }
 0x259   :  { %1972 = vmatprep.subr.mxu0 %v1421_v39  ;;  %2011 = vmatprep.subr.mxu1 %v1525_v51 }
 0x25a   :  { %1973 = vmatpush3.msra.mxu0 %v1405_v52  ;;  %2012 = vmatpush3.msra.mxu1 %v1509_v55 }
 0x25b   :  { %1974 = vmatprep.subr.mxu0 %v1420_v56  ;;  %2013 = vmatprep.subr.mxu1 %v1524_v38 }
 0x25c   :  { %1975 = vmatpush3.msra.mxu0 %v1404_v7  ;;  %2014 = vmatpush3.msra.mxu1 %v1508_v18 }
 0x25d   :  { %1976 = vmatprep.subr.mxu0 %v1419_v58  ;;  %2015 = vmatprep.subr.mxu1 %v1523_v59 }
 0x25e   :  { %1977 = vmatpush3.msra.mxu0 %v1403_v60  ;;  %2016 = vmatpush3.msra.mxu1 %v1507_v61 }
 0x25f   :  { %1978 = vmatprep.subr.mxu0 %v1418_v35  ;;  %1604 = vmatmul.mubr.f32.vlgmr.msra.gmra.mxu1 %v963_v62 }
 0x260   :  { %1979 = vmatpush3.msra.mxu0 %v1402_v41 }
 0x261   :  { %1980 = vmatprep.subr.mxu0 %v1417_v63 }
 0x262   :  { %1981 = vmatpush3.msra.mxu0 %v1401_v1 }
 0x263   :  { %1498 = vmatmul.mubr.f32.vlgmr.msra.gmra.mxu0 %v961_v50  ;;  %2169 = vmatprep.subr.mxu0 %v2284_v57 }
 0x264   :  { %2170 = vmatpush3.msra.mxu0 %v1634_v0  ;;  %2201 = vmatprep.mubr.msk.f32.mxu0 %vm2285_vm0, %v2284_v57 }
 0x265   :  { %2171 = vmatprep.subr.mxu0 %v2284_v57 }
 0x266   :  { %2172 = vmatpush3.msra.mxu0 %v1633_v2 }
 0x267   :  { %2173 = vmatprep.subr.mxu0 %v2284_v57 }
 0x268   :  { %2174 = vmatpush3.msra.mxu0 %v1632_v54 }
 0x269   :  { %2175 = vmatprep.subr.mxu0 %v2284_v57 }
 0x26a   :  { %2176 = vmatpush3.msra.mxu0 %v1631_v3 }
 0x26b   :  { %2177 = vmatprep.subr.mxu0 %v2284_v57 }
 0x26c   :  { %2178 = vmatpush3.msra.mxu0 %v1630_v4 }
 0x26d   :  { %2179 = vmatprep.subr.mxu0 %v2284_v57 }
 0x26e   :  { %2180 = vmatpush3.msra.mxu0 %v1629_v6 }
 0x26f   :  { %2181 = vmatprep.subr.mxu0 %v2284_v57 }
 0x270   :  { %2182 = vmatpush3.msra.mxu0 %v1628_v53 }
 0x271   :  { %2183 = vmatprep.subr.mxu0 %v2284_v57 }
 0x272   :  { %2184 = vmatpush3.msra.mxu0 %v1627_v8 }
 0x273   :  { %2185 = vmatprep.subr.mxu0 %v2284_v57 }
 0x274   :  { %2186 = vmatpush3.msra.mxu0 %v1626_v9 }
 0x275   :  { %2187 = vmatprep.subr.mxu0 %v2284_v57 }
 0x276   :  { %2188 = vmatpush3.msra.mxu0 %v1625_v11 }
 0x277   :  { %2189 = vmatprep.subr.mxu0 %v2284_v57 }
 0x278   :  { %2190 = vmatpush3.msra.mxu0 %v1624_v12 }
 0x279   :  { %2191 = vmatprep.subr.mxu0 %v2284_v57 }
 0x27a   :  { %2192 = vmatpush3.msra.mxu0 %v1623_v13 }
 0x27b   :  { %2193 = vmatprep.subr.mxu0 %v2284_v57 }
 0x27c   :  { %2194 = vmatpush3.msra.mxu0 %v1622_v14 }
 0x27d   :  { %2195 = vmatprep.subr.mxu0 %v2284_v57 }
 0x27e   :  { %2196 = vmatpush3.msra.mxu0 %v1621_v15 }
 0x27f   :  { %2197 = vmatprep.subr.mxu0 %v2284_v57 }
 0x280   :  { %2198 = vmatpush3.msra.mxu0 %v1620_v16 }
 0x281   :  { %2199 = vmatprep.subr.mxu0 %v2284_v57 }
 0x282   :  { %2200 = vmatpush3.msra.mxu0 %v1619_v17 }
 0x2dc   :  { %v1877_v21 = vpop.f32.mrf.mxu1 }
 0x2de   :  { %v1878_v24 = vpop.f32.mrf.mxu1 }
 0x2df   :  { %v1879_v27 = vadd.f32 %v1878_v24, %v1877_v21 }
 0x2e0   :  { %v1842_v19 = vpop.f32.mrf.mxu0 }
 0x2e2   :  { %v1843_v22 = vpop.f32.mrf.mxu0 }
 0x2e3   :  { %v1844_v26 = vadd.f32 %v1843_v22, %v1842_v19 }
 0x2e5   :  { %v1183_v30 = vadd.f32 %v1879_v27, %v1844_v26 }
 0x2fd   :  { %v1947_v5 = vpop.f32.mrf.mxu1 }
 0x2ff   :  { %v1948_v29 = vpop.f32.mrf.mxu1 }
 0x300   :  { %v1949_v33 = vadd.f32 %v1948_v29, %v1947_v5 }
 0x302   :  { %v1912_v23 = vpop.f32.mrf.mxu0 }
 0x304   :  { %v1913_v25 = vpop.f32.mrf.mxu0 }
 0x305   :  { %v1914_v28 = vadd.f32 %v1913_v25, %v1912_v23 }
 0x307   :  { %v1291_v32 = vadd.f32 %v1914_v28, %v1183_v30 }
 0x309   :  { %v1397_v37 = vadd.f32 %v1949_v33, %v1291_v32 }
 0x31f   :  { %v2017_v31 = vpop.f32.mrf.mxu1 }
 0x321   :  { %v2018_v36 = vpop.f32.mrf.mxu1 }
 0x322   :  { %v2019_v46 = vadd.f32 %v2018_v36, %v2017_v31 }
 0x323   :  { %v1982_v48 = vpop.f32.mrf.mxu0 }
 0x325   :  { %v1983_v34 = vpop.f32.mrf.mxu0 }
 0x326   :  { %v1984_v57 = vadd.f32 %v1983_v34, %v1982_v48 }
 0x328   :  { %v1503_v20 = vadd.f32 %v1984_v57, %v1397_v37 }
 0x32a   :  { %v1609_v42 = vadd.f32 %v2019_v46, %v1503_v20 }
 0x32c   :  { %v1617_v43 = vadd.f32 %v1736_v40, %v1609_v42 }
 0x32e   :  { %v1618_v44 = vmax.f32 %v1617_v43, 0.0 }
 0x330   :  { %2202 = vmatmul.mubr.f32.vlgmr.msra.gmra.mxu0 %v1618_v44 }
 0x3f0   :  { %v1708_v47 = vpop.f32.mrf.mxu0 }
 0x3f1   :  { %v1709_v49 = vadd.f32 %v1737_v45, %v1708_v47 }
 0x3f2   :  { %v2203_v10 = vpop.f32.mrf.mxu0 }
 0x3f3   :  { %1712 = vst [vmem:[%s2577_s9] sm:$0xff] %v1709_v49 }
 0x3f4   :  { %1717 = vsyncpa [#allocation5], 1 }
 0x3f5   :  { %1718 = vsyncpa [#allocation7], 1 }

</bundles_post_ra>
